<compile_context>
chip_gen: v7x
topology: tpu7x:2x2x1
jax: 0.10.0
libtpu: 0.0.40
codegen_flags: <defaults>
</compile_context>

<pallas_src>
import functools

import jax
import jax.numpy as jnp
from jax.experimental import pallas as pl
from jax.experimental.pallas import tpu as pltpu


# ---------------------------------------------------------------------------
# Pallas kernel: one grid step == one batch element.
# ---------------------------------------------------------------------------
def mask_predictor_kernel(*refs, W, HW, Cx, is_last):
    if is_last:
        (x_ref, f_ref, m_ref, w1_ref, b1_ref, w2_ref, b2_ref,
         w3_ref, b3_ref, out_ref, cat_ref) = refs
    else:
        (x_ref, f_ref, m_ref, w1_ref, b1_ref, w2_ref, b2_ref,
         out_ref, cat_ref) = refs

    cdt = w1_ref.dtype  # compute (MXU operand) dtype, e.g. bf16

    # Fused channel-concat + bf16 cast: x and f rows land in one (Cin, HW) VMEM
    # scratch so conv1 is a single K=(Cx+Cf) contraction per tap (better MXU
    # fill; removes a full (hidden, HW) f32 result-pop + VPU add on MRF chips).
    cat_ref[0:Cx, :] = x_ref[0].astype(cdt)
    cat_ref[Cx:, :] = f_ref[0].astype(cdt)
    cat = cat_ref[...]

    def conv3x3(w_ref, inp):
        # Tap-wise accumulation: 9 matmuls (hidden, Cin)@(Cin, HW).  Each tap's
        # spatial shift is applied to the *result* with a lane roll (XLU slot,
        # overlaps VPU/MXU) plus a precomputed boundary mask (single VPU mul).
        # Live f32 footprint: 2 x (hidden, HW) instead of (9*hidden, HW).
        acc = jnp.dot(w_ref[4], inp, preferred_element_type=jnp.float32)
        for t in range(9):
            if t == 4:
                continue
            sh, sw = t // 3 - 1, t % 3 - 1
            shift = (-(sh * W + sw)) % HW                 # static, non-negative
            y = jnp.dot(w_ref[t], inp, preferred_element_type=jnp.float32)
            y = pltpu.roll(y, shift, axis=1)
            mi = t if t < 4 else t - 1                    # mask row for this tap
            acc = acc + y * m_ref[mi]                     # m_ref[mi]: (1, HW)
        return acc

    # conv1 (3x3, pad=1, no bias) + BN(eval) + ReLU.  BN scale is already folded
    # into w1's rows in the wrapper; only the per-channel shift remains here.
    h1 = jnp.maximum(conv3x3(w1_ref, cat) + b1_ref[...], 0.0)

    # conv2 (3x3, pad=1, no bias) + BN(eval) + ReLU (scale folded into w2).
    h2 = jnp.maximum(conv3x3(w2_ref, h1.astype(cdt)) + b2_ref[...], 0.0)

    # Final 1x1 conv (+bias); statically skipped when is_last=False.
    if is_last:
        out = jnp.dot(w3_ref[...], h2.astype(cdt),
                      preferred_element_type=jnp.float32) + b3_ref[...]
    else:
        out = h2
    out_ref[0] = out                                      # (out_ch, H*W): lane-dense


# ---------------------------------------------------------------------------
# Glue (plain JAX)
# ---------------------------------------------------------------------------
def _bilinear_align_corners(x, oh, ow):
    """F.interpolate(mode='bilinear', align_corners=True) on NCHW input."""
    B, C, H, W = x.shape
    hs = jnp.arange(oh, dtype=jnp.float32) * ((H - 1) / (oh - 1) if oh > 1 else 0.0)
    ws = jnp.arange(ow, dtype=jnp.float32) * ((W - 1) / (ow - 1) if ow > 1 else 0.0)
    h0 = jnp.floor(hs).astype(jnp.int32); h1 = jnp.clip(h0 + 1, 0, H - 1)
    w0 = jnp.floor(ws).astype(jnp.int32); w1 = jnp.clip(w0 + 1, 0, W - 1)
    th = (hs - h0)[None, None, :, None]
    tw = (ws - w0)[None, None, None, :]
    rows = x[:, :, h0, :] * (1.0 - th) + x[:, :, h1, :] * th          # (B,C,oh,W)
    return rows[:, :, :, w0] * (1.0 - tw) + rows[:, :, :, w1] * tw    # (B,C,oh,ow)


def mask_predictor_forward(x, f, params, *, is_last=True,
                           compute_dtype=jnp.bfloat16):
    """x: (B, Cx, Hx, Wx), f: (B, Cf, Hf, Wf) in NCHW. Returns NCHW output."""
    B, Cx, Hx, Wx = x.shape
    _, Cf, Hf, Wf = f.shape
    hidden = params["w1_oihw"].shape[0]
    Cin = Cx + Cf
    HW = Hf * Wf
    eps = 1e-5

    if Hx < Hf or Wx < Wf:
        x = _bilinear_align_corners(x, Hf, Wf)

    # NCHW -> (B, C, H*W): free reshapes.  NOTE: inputs stay f32; the bf16 cast
    # happens inside the kernel (halves input HBM traffic vs a wrapper cast).
    x2 = x.reshape(B, Cx, HW)
    f2 = f.reshape(B, Cf, HW)

    # Boundary masks for the 8 off-centre taps, precomputed once and fetched
    # with a constant-index BlockSpec (DMA happens a single time).
    col = jnp.arange(HW, dtype=jnp.int32)
    hh, ww = col // Wf, col % Wf
    mlist = []
    for t in range(9):
        if t == 4:
            continue
        sh, sw = t // 3 - 1, t % 3 - 1
        mlist.append((hh + sh >= 0) & (hh + sh < Hf) &
                     (ww + sw >= 0) & (ww + sw < Wf))
    masks = jnp.stack(mlist).astype(jnp.float32).reshape(8, 1, HW)

    # Eval-mode BN: fold the scale into the conv weights (pre-bf16-cast), keep
    # only the per-channel shift as a kernel input.
    def bn_scale_shift(gamma, beta, mean, var):
        s = gamma / jnp.sqrt(var + eps)
        return s, (beta - mean * s)

    s1, t1 = bn_scale_shift(params["bn1_gamma"], params["bn1_beta"],
                            params["bn1_mean"], params["bn1_var"])
    s2, t2 = bn_scale_shift(params["bn2_gamma"], params["bn2_beta"],
                            params["bn2_mean"], params["bn2_var"])

    # 3x3 weights OIHW -> (9, hidden, Cin); tap t = dh*3 + dw on the leading dim
    # (leading-dim indexing per tap -> no unaligned sublane slices in-kernel).
    w1_r = jnp.transpose(params["w1_oihw"], (2, 3, 0, 1)).reshape(9, hidden, Cin)
    w1_r = (w1_r * s1[None, :, None]).astype(compute_dtype)
    w2_r = jnp.transpose(params["w2_oihw"], (2, 3, 0, 1)).reshape(9, hidden, hidden)
    w2_r = (w2_r * s2[None, :, None]).astype(compute_dtype)
    b1 = t1.reshape(hidden, 1).astype(jnp.float32)
    b2 = t2.reshape(hidden, 1).astype(jnp.float32)

    inputs = [x2, f2, masks, w1_r, b1, w2_r, b2]
    in_specs = [
        pl.BlockSpec((1, Cx, HW), lambda b: (b, 0, 0)),
        pl.BlockSpec((1, Cf, HW), lambda b: (b, 0, 0)),
        pl.BlockSpec((8, 1, HW), lambda b: (0, 0, 0)),
        pl.BlockSpec((9, hidden, Cin), lambda b: (0, 0, 0)),
        pl.BlockSpec((hidden, 1), lambda b: (0, 0)),
        pl.BlockSpec((9, hidden, hidden), lambda b: (0, 0, 0)),
        pl.BlockSpec((hidden, 1), lambda b: (0, 0)),
    ]
    if is_last:
        out_ch = params["w3_oihw"].shape[0]
        w3 = params["w3_oihw"][:, :, 0, 0].astype(compute_dtype)       # (2, hidden)
        b3 = params["b3"].reshape(-1, 1).astype(jnp.float32)           # (2, 1)
        inputs += [w3, b3]
        in_specs += [pl.BlockSpec((out_ch, hidden), lambda b: (0, 0)),
                     pl.BlockSpec((out_ch, 1), lambda b: (0, 0))]
    else:
        out_ch = hidden

    kern = functools.partial(mask_predictor_kernel, W=Wf, HW=HW, Cx=Cx,
                             is_last=is_last)

    out_flat = pl.pallas_call(
        kern,
        out_shape=jax.ShapeDtypeStruct((B, out_ch, HW), jnp.float32),
        grid_spec=pltpu.PrefetchScalarGridSpec(
            num_scalar_prefetch=0,
            grid=(B,),
            in_specs=in_specs,
            out_specs=pl.BlockSpec((1, out_ch, HW), lambda b: (b, 0, 0)),
            scratch_shapes=[pltpu.VMEM((Cin, HW), compute_dtype)],     # concat buf
        ),
        compiler_params=pltpu.CompilerParams(
            dimension_semantics=("parallel",),
            # Explicit override: v5e's default scoped VMEM is 16 MiB; 32 MiB is
            # safe on every generation (v7x physical VMEM is 64 MiB total).
            vmem_limit_bytes=32 * 1024 * 1024),
    )(*inputs)

    # (B, out_ch, H*W) -> NCHW is a free reshape (output already channel-major).
    return out_flat.reshape(B, out_ch, Hf, Wf)


# ---------------------------------------------------------------------------
# Pure-JAX reference (for the correctness check)
# ---------------------------------------------------------------------------
def ref_forward(x, f, params, *, is_last=True):
    eps = 1e-5
    if x.shape[-2] < f.shape[-2] or x.shape[-1] < f.shape[-1]:
        x = _bilinear_align_corners(x, f.shape[-2], f.shape[-1])
    h = jnp.concatenate([x, f], axis=1)

    def conv3x3(inp, w_oihw):
        return jax.lax.conv_general_dilated(
            inp, w_oihw, window_strides=(1, 1), padding="SAME",
            dimension_numbers=("NCHW", "OIHW", "NCHW"))

    def bn(inp, g, b, m, v):
        return ((inp - m[None, :, None, None]) / jnp.sqrt(v[None, :, None, None] + eps)
                * g[None, :, None, None] + b[None, :, None, None])

    h = jax.nn.relu(bn(conv3x3(h, params["w1_oihw"]), params["bn1_gamma"],
                       params["bn1_beta"], params["bn1_mean"], params["bn1_var"]))
    h = jax.nn.relu(bn(conv3x3(h, params["w2_oihw"]), params["bn2_gamma"],
                       params["bn2_beta"], params["bn2_mean"], params["bn2_var"]))
    if is_last:
        h = jax.lax.conv_general_dilated(
            h, params["w3_oihw"], (1, 1), "VALID",
            dimension_numbers=("NCHW", "OIHW", "NCHW"))
        h = h + params["b3"][None, :, None, None]
    return h


def init_params(key, in_feat_dim, factor=2, is_last=True):
    hidden = in_feat_dim // factor
    c0 = hidden + in_feat_dim
    k1, k2, k3, k4 = jax.random.split(key, 4)
    ar = jnp.arange(hidden, dtype=jnp.float32)
    params = {
        "w1_oihw": 0.1 * jax.random.normal(k1, (hidden, c0, 3, 3), jnp.float32),
        "bn1_gamma": 1.0 + 0.10 * ar, "bn1_beta": 0.05 * ar,
        "bn1_mean": 0.02 * ar, "bn1_var": 1.0 + 0.10 * ar,
        "w2_oihw": 0.1 * jax.random.normal(k2, (hidden, hidden, 3, 3), jnp.float32),
        "bn2_gamma": 1.0 - 0.05 * ar, "bn2_beta": -0.03 * ar,
        "bn2_mean": 0.01 * ar, "bn2_var": 1.0 + 0.20 * ar,
    }
    if is_last:
        params["w3_oihw"] = 0.1 * jax.random.normal(k3, (2, hidden, 1, 1), jnp.float32)
        params["b3"] = 0.1 * jax.random.normal(k4, (2,), jnp.float32)
    return params


if __name__ == "__main__":
    key = jax.random.PRNGKey(0)
    in_feat_dim, factor = 8, 2
    hidden = in_feat_dim // factor
    kp, kx, kf = jax.random.split(key, 3)

    # x has hidden channels at half resolution -> exercises the bilinear upsample path
    x = jax.random.normal(kx, (2, hidden, 8, 8), jnp.float32)
    f = jax.random.normal(kf, (2, in_feat_dim, 16, 16), jnp.float32)

    for is_last in (True, False):
        params = init_params(kp, in_feat_dim, factor, is_last)
        out = jax.block_until_ready(
            mask_predictor_forward(x, f, params, is_last=is_last))
        ref = ref_forward(x, f, params, is_last=is_last)
        expect_ch = 2 if is_last else hidden
        assert out.shape == ref.shape == (2, expect_ch, 16, 16), out.shape
        err = float(jnp.max(jnp.abs(out - ref)))
        # bf16 MXU operands (with BN scale folded in) + f32 accumulation.
        assert jnp.allclose(out, ref, rtol=2e-2, atol=2e-2), err

    print("KERNEL_OK")
</pallas_src>

<mosaic_0001>
module attributes {stable_mosaic.version = 11 : i64} {
  func.func @mask_predictor_kernel(%arg0: i32, %arg1: memref<1x4x256xf32, #tpu.memory_space<vmem>>, %arg2: memref<1x8x256xf32, #tpu.memory_space<vmem>>, %arg3: memref<8x1x256xf32, #tpu.memory_space<vmem>>, %arg4: memref<9x4x12xbf16, #tpu.memory_space<vmem>>, %arg5: memref<4x1xf32, #tpu.memory_space<vmem>>, %arg6: memref<9x4x4xbf16, #tpu.memory_space<vmem>>, %arg7: memref<4x1xf32, #tpu.memory_space<vmem>>, %arg8: memref<2x4xbf16, #tpu.memory_space<vmem>>, %arg9: memref<2x1xf32, #tpu.memory_space<vmem>>, %arg10: memref<1x2x256xf32, #tpu.memory_space<vmem>>, %arg11: memref<12x256xbf16, #tpu.memory_space<vmem>>) attributes {dimension_semantics = [#tpu.dimension_semantics<parallel>], iteration_bounds = array<i64: 2>, scalar_prefetch = 0 : i64, scratch_operands = 1 : i64, tpu.core_type = #tpu.core_type<tc>, window_params = [{transform_indices = @transform_0, window_bounds = array<i64: 1, 4, 256>}, {transform_indices = @transform_1, window_bounds = array<i64: 1, 8, 256>}, {pipeline_mode = #tpu.pipeline_mode<synchronous>, transform_indices = @transform_2, window_bounds = array<i64: 8, 1, 256>}, {pipeline_mode = #tpu.pipeline_mode<synchronous>, transform_indices = @transform_3, window_bounds = array<i64: 9, 4, 12>}, {pipeline_mode = #tpu.pipeline_mode<synchronous>, transform_indices = @transform_4, window_bounds = array<i64: 4, 1>}, {pipeline_mode = #tpu.pipeline_mode<synchronous>, transform_indices = @transform_5, window_bounds = array<i64: 9, 4, 4>}, {pipeline_mode = #tpu.pipeline_mode<synchronous>, transform_indices = @transform_6, window_bounds = array<i64: 4, 1>}, {pipeline_mode = #tpu.pipeline_mode<synchronous>, transform_indices = @transform_7, window_bounds = array<i64: 2, 4>}, {pipeline_mode = #tpu.pipeline_mode<synchronous>, transform_indices = @transform_8, window_bounds = array<i64: 2, 1>}, {transform_indices = @transform_9, window_bounds = array<i64: 1, 2, 256>}]} {
    %c0 = arith.constant 0 : index
    %c0_0 = arith.constant 0 : index
    %c0_1 = arith.constant 0 : index
    %0 = vector.load %arg1[%c0, %c0_0, %c0_1] : memref<1x4x256xf32, #tpu.memory_space<vmem>>, vector<1x4x256xf32>
    %1 = vector.shape_cast %0 : vector<1x4x256xf32> to vector<4x256xf32>
    %2 = arith.truncf %1 : vector<4x256xf32> to vector<4x256xbf16>
    %c0_2 = arith.constant 0 : index
    %c0_3 = arith.constant 0 : index
    %3 = vector.load %arg11[%c0_2, %c0_3] : memref<12x256xbf16, #tpu.memory_space<vmem>>, vector<4x256xbf16>
    tpu.vector_store %arg11[%c0_2, %c0_3], %2 {strides = array<i32>} : memref<12x256xbf16, #tpu.memory_space<vmem>>, vector<4x256xbf16>,
    %c0_4 = arith.constant 0 : index
    %c0_5 = arith.constant 0 : index
    %c0_6 = arith.constant 0 : index
    %4 = vector.load %arg2[%c0_4, %c0_5, %c0_6] : memref<1x8x256xf32, #tpu.memory_space<vmem>>, vector<1x8x256xf32>
    %5 = vector.shape_cast %4 : vector<1x8x256xf32> to vector<8x256xf32>
    %6 = arith.truncf %5 : vector<8x256xf32> to vector<8x256xbf16>
    %c4 = arith.constant 4 : index
    %c0_7 = arith.constant 0 : index
    %7 = vector.load %arg11[%c4, %c0_7] : memref<12x256xbf16, #tpu.memory_space<vmem>>, vector<8x256xbf16>
    tpu.vector_store %arg11[%c4, %c0_7], %6 {strides = array<i32>} : memref<12x256xbf16, #tpu.memory_space<vmem>>, vector<8x256xbf16>,
    %c0_8 = arith.constant 0 : index
    %c0_9 = arith.constant 0 : index
    %8 = vector.load %arg11[%c0_8, %c0_9] : memref<12x256xbf16, #tpu.memory_space<vmem>>, vector<12x256xbf16>
    %c4_10 = arith.constant 4 : index
    %c0_11 = arith.constant 0 : index
    %c0_12 = arith.constant 0 : index
    %9 = vector.load %arg4[%c4_10, %c0_11, %c0_12] : memref<9x4x12xbf16, #tpu.memory_space<vmem>>, vector<1x4x12xbf16>
    %10 = vector.shape_cast %9 : vector<1x4x12xbf16> to vector<4x12xbf16>
    %cst = arith.constant dense<0.000000e+00> : vector<4x256xf32>
    %11 = tpu.matmul %10, %8, %cst {dimension_numbers = #tpu.dot_dimension_numbers<[1], [0], [0], [1], [0, 0, 1, 1], [], []>} : vector<4x12xbf16>, vector<12x256xbf16>, vector<4x256xf32> -> vector<4x256xf32>
    %c0_13 = arith.constant 0 : index
    %c0_14 = arith.constant 0 : index
    %c0_15 = arith.constant 0 : index
    %12 = vector.load %arg4[%c0_13, %c0_14, %c0_15] : memref<9x4x12xbf16, #tpu.memory_space<vmem>>, vector<1x4x12xbf16>
    %13 = vector.shape_cast %12 : vector<1x4x12xbf16> to vector<4x12xbf16>
    %cst_16 = arith.constant dense<0.000000e+00> : vector<4x256xf32>
    %14 = tpu.matmul %13, %8, %cst_16 {dimension_numbers = #tpu.dot_dimension_numbers<[1], [0], [0], [1], [0, 0, 1, 1], [], []>} : vector<4x12xbf16>, vector<12x256xbf16>, vector<4x256xf32> -> vector<4x256xf32>
    %c17_i32 = arith.constant 17 : i32
    %15 = tpu.dynamic_rotate %14 by %c17_i32 dim 1 : vector<4x256xf32>, i32 -> vector<4x256xf32>
    %c0_17 = arith.constant 0 : index
    %c0_18 = arith.constant 0 : index
    %c0_19 = arith.constant 0 : index
    %16 = vector.load %arg3[%c0_17, %c0_18, %c0_19] : memref<8x1x256xf32, #tpu.memory_space<vmem>>, vector<1x1x256xf32>
    %17 = vector.shape_cast %16 : vector<1x1x256xf32> to vector<1x256xf32>
    %18 = vector.broadcast %17 : vector<1x256xf32> to vector<4x256xf32>
    %19 = arith.mulf %15, %18 : vector<4x256xf32>
    %20 = arith.addf %11, %19 : vector<4x256xf32>
    %c1 = arith.constant 1 : index
    %c0_20 = arith.constant 0 : index
    %c0_21 = arith.constant 0 : index
    %21 = vector.load %arg4[%c1, %c0_20, %c0_21] : memref<9x4x12xbf16, #tpu.memory_space<vmem>>, vector<1x4x12xbf16>
    %22 = vector.shape_cast %21 : vector<1x4x12xbf16> to vector<4x12xbf16>
    %cst_22 = arith.constant dense<0.000000e+00> : vector<4x256xf32>
    %23 = tpu.matmul %22, %8, %cst_22 {dimension_numbers = #tpu.dot_dimension_numbers<[1], [0], [0], [1], [0, 0, 1, 1], [], []>} : vector<4x12xbf16>, vector<12x256xbf16>, vector<4x256xf32> -> vector<4x256xf32>
    %c16_i32 = arith.constant 16 : i32
    %24 = tpu.dynamic_rotate %23 by %c16_i32 dim 1 : vector<4x256xf32>, i32 -> vector<4x256xf32>
    %c1_23 = arith.constant 1 : index
    %c0_24 = arith.constant 0 : index
    %c0_25 = arith.constant 0 : index
    %25 = vector.load %arg3[%c1_23, %c0_24, %c0_25] : memref<8x1x256xf32, #tpu.memory_space<vmem>>, vector<1x1x256xf32>
    %26 = vector.shape_cast %25 : vector<1x1x256xf32> to vector<1x256xf32>
    %27 = vector.broadcast %26 : vector<1x256xf32> to vector<4x256xf32>
    %28 = arith.mulf %24, %27 : vector<4x256xf32>
    %29 = arith.addf %20, %28 : vector<4x256xf32>
    %c2 = arith.constant 2 : index
    %c0_26 = arith.constant 0 : index
    %c0_27 = arith.constant 0 : index
    %30 = vector.load %arg4[%c2, %c0_26, %c0_27] : memref<9x4x12xbf16, #tpu.memory_space<vmem>>, vector<1x4x12xbf16>
    %31 = vector.shape_cast %30 : vector<1x4x12xbf16> to vector<4x12xbf16>
    %cst_28 = arith.constant dense<0.000000e+00> : vector<4x256xf32>
    %32 = tpu.matmul %31, %8, %cst_28 {dimension_numbers = #tpu.dot_dimension_numbers<[1], [0], [0], [1], [0, 0, 1, 1], [], []>} : vector<4x12xbf16>, vector<12x256xbf16>, vector<4x256xf32> -> vector<4x256xf32>
    %c15_i32 = arith.constant 15 : i32
    %33 = tpu.dynamic_rotate %32 by %c15_i32 dim 1 : vector<4x256xf32>, i32 -> vector<4x256xf32>
    %c2_29 = arith.constant 2 : index
    %c0_30 = arith.constant 0 : index
    %c0_31 = arith.constant 0 : index
    %34 = vector.load %arg3[%c2_29, %c0_30, %c0_31] : memref<8x1x256xf32, #tpu.memory_space<vmem>>, vector<1x1x256xf32>
    %35 = vector.shape_cast %34 : vector<1x1x256xf32> to vector<1x256xf32>
    %36 = vector.broadcast %35 : vector<1x256xf32> to vector<4x256xf32>
    %37 = arith.mulf %33, %36 : vector<4x256xf32>
    %38 = arith.addf %29, %37 : vector<4x256xf32>
    %c3 = arith.constant 3 : index
    %c0_32 = arith.constant 0 : index
    %c0_33 = arith.constant 0 : index
    %39 = vector.load %arg4[%c3, %c0_32, %c0_33] : memref<9x4x12xbf16, #tpu.memory_space<vmem>>, vector<1x4x12xbf16>
    %40 = vector.shape_cast %39 : vector<1x4x12xbf16> to vector<4x12xbf16>
    %cst_34 = arith.constant dense<0.000000e+00> : vector<4x256xf32>
    %41 = tpu.matmul %40, %8, %cst_34 {dimension_numbers = #tpu.dot_dimension_numbers<[1], [0], [0], [1], [0, 0, 1, 1], [], []>} : vector<4x12xbf16>, vector<12x256xbf16>, vector<4x256xf32> -> vector<4x256xf32>
    %c1_i32 = arith.constant 1 : i32
    %42 = tpu.dynamic_rotate %41 by %c1_i32 dim 1 : vector<4x256xf32>, i32 -> vector<4x256xf32>
    %c3_35 = arith.constant 3 : index
    %c0_36 = arith.constant 0 : index
    %c0_37 = arith.constant 0 : index
    %43 = vector.load %arg3[%c3_35, %c0_36, %c0_37] : memref<8x1x256xf32, #tpu.memory_space<vmem>>, vector<1x1x256xf32>
    %44 = vector.shape_cast %43 : vector<1x1x256xf32> to vector<1x256xf32>
    %45 = vector.broadcast %44 : vector<1x256xf32> to vector<4x256xf32>
    %46 = arith.mulf %42, %45 : vector<4x256xf32>
    %47 = arith.addf %38, %46 : vector<4x256xf32>
    %c5 = arith.constant 5 : index
    %c0_38 = arith.constant 0 : index
    %c0_39 = arith.constant 0 : index
    %48 = vector.load %arg4[%c5, %c0_38, %c0_39] : memref<9x4x12xbf16, #tpu.memory_space<vmem>>, vector<1x4x12xbf16>
    %49 = vector.shape_cast %48 : vector<1x4x12xbf16> to vector<4x12xbf16>
    %cst_40 = arith.constant dense<0.000000e+00> : vector<4x256xf32>
    %50 = tpu.matmul %49, %8, %cst_40 {dimension_numbers = #tpu.dot_dimension_numbers<[1], [0], [0], [1], [0, 0, 1, 1], [], []>} : vector<4x12xbf16>, vector<12x256xbf16>, vector<4x256xf32> -> vector<4x256xf32>
    %c255_i32 = arith.constant 255 : i32
    %51 = tpu.dynamic_rotate %50 by %c255_i32 dim 1 : vector<4x256xf32>, i32 -> vector<4x256xf32>
    %c4_41 = arith.constant 4 : index
    %c0_42 = arith.constant 0 : index
    %c0_43 = arith.constant 0 : index
    %52 = vector.load %arg3[%c4_41, %c0_42, %c0_43] : memref<8x1x256xf32, #tpu.memory_space<vmem>>, vector<1x1x256xf32>
    %53 = vector.shape_cast %52 : vector<1x1x256xf32> to vector<1x256xf32>
    %54 = vector.broadcast %53 : vector<1x256xf32> to vector<4x256xf32>
    %55 = arith.mulf %51, %54 : vector<4x256xf32>
    %56 = arith.addf %47, %55 : vector<4x256xf32>
    %c6 = arith.constant 6 : index
    %c0_44 = arith.constant 0 : index
    %c0_45 = arith.constant 0 : index
    %57 = vector.load %arg4[%c6, %c0_44, %c0_45] : memref<9x4x12xbf16, #tpu.memory_space<vmem>>, vector<1x4x12xbf16>
    %58 = vector.shape_cast %57 : vector<1x4x12xbf16> to vector<4x12xbf16>
    %cst_46 = arith.constant dense<0.000000e+00> : vector<4x256xf32>
    %59 = tpu.matmul %58, %8, %cst_46 {dimension_numbers = #tpu.dot_dimension_numbers<[1], [0], [0], [1], [0, 0, 1, 1], [], []>} : vector<4x12xbf16>, vector<12x256xbf16>, vector<4x256xf32> -> vector<4x256xf32>
    %c241_i32 = arith.constant 241 : i32
    %60 = tpu.dynamic_rotate %59 by %c241_i32 dim 1 : vector<4x256xf32>, i32 -> vector<4x256xf32>
    %c5_47 = arith.constant 5 : index
    %c0_48 = arith.constant 0 : index
    %c0_49 = arith.constant 0 : index
    %61 = vector.load %arg3[%c5_47, %c0_48, %c0_49] : memref<8x1x256xf32, #tpu.memory_space<vmem>>, vector<1x1x256xf32>
    %62 = vector.shape_cast %61 : vector<1x1x256xf32> to vector<1x256xf32>
    %63 = vector.broadcast %62 : vector<1x256xf32> to vector<4x256xf32>
    %64 = arith.mulf %60, %63 : vector<4x256xf32>
    %65 = arith.addf %56, %64 : vector<4x256xf32>
    %c7 = arith.constant 7 : index
    %c0_50 = arith.constant 0 : index
    %c0_51 = arith.constant 0 : index
    %66 = vector.load %arg4[%c7, %c0_50, %c0_51] : memref<9x4x12xbf16, #tpu.memory_space<vmem>>, vector<1x4x12xbf16>
    %67 = vector.shape_cast %66 : vector<1x4x12xbf16> to vector<4x12xbf16>
    %cst_52 = arith.constant dense<0.000000e+00> : vector<4x256xf32>
    %68 = tpu.matmul %67, %8, %cst_52 {dimension_numbers = #tpu.dot_dimension_numbers<[1], [0], [0], [1], [0, 0, 1, 1], [], []>} : vector<4x12xbf16>, vector<12x256xbf16>, vector<4x256xf32> -> vector<4x256xf32>
    %c240_i32 = arith.constant 240 : i32
    %69 = tpu.dynamic_rotate %68 by %c240_i32 dim 1 : vector<4x256xf32>, i32 -> vector<4x256xf32>
    %c6_53 = arith.constant 6 : index
    %c0_54 = arith.constant 0 : index
    %c0_55 = arith.constant 0 : index
    %70 = vector.load %arg3[%c6_53, %c0_54, %c0_55] : memref<8x1x256xf32, #tpu.memory_space<vmem>>, vector<1x1x256xf32>
    %71 = vector.shape_cast %70 : vector<1x1x256xf32> to vector<1x256xf32>
    %72 = vector.broadcast %71 : vector<1x256xf32> to vector<4x256xf32>
    %73 = arith.mulf %69, %72 : vector<4x256xf32>
    %74 = arith.addf %65, %73 : vector<4x256xf32>
    %c8 = arith.constant 8 : index
    %c0_56 = arith.constant 0 : index
    %c0_57 = arith.constant 0 : index
    %75 = vector.load %arg4[%c8, %c0_56, %c0_57] : memref<9x4x12xbf16, #tpu.memory_space<vmem>>, vector<1x4x12xbf16>
    %76 = vector.shape_cast %75 : vector<1x4x12xbf16> to vector<4x12xbf16>
    %cst_58 = arith.constant dense<0.000000e+00> : vector<4x256xf32>
    %77 = tpu.matmul %76, %8, %cst_58 {dimension_numbers = #tpu.dot_dimension_numbers<[1], [0], [0], [1], [0, 0, 1, 1], [], []>} : vector<4x12xbf16>, vector<12x256xbf16>, vector<4x256xf32> -> vector<4x256xf32>
    %c239_i32 = arith.constant 239 : i32
    %78 = tpu.dynamic_rotate %77 by %c239_i32 dim 1 : vector<4x256xf32>, i32 -> vector<4x256xf32>
    %c7_59 = arith.constant 7 : index
    %c0_60 = arith.constant 0 : index
    %c0_61 = arith.constant 0 : index
    %79 = vector.load %arg3[%c7_59, %c0_60, %c0_61] : memref<8x1x256xf32, #tpu.memory_space<vmem>>, vector<1x1x256xf32>
    %80 = vector.shape_cast %79 : vector<1x1x256xf32> to vector<1x256xf32>
    %81 = vector.broadcast %80 : vector<1x256xf32> to vector<4x256xf32>
    %82 = arith.mulf %78, %81 : vector<4x256xf32>
    %83 = arith.addf %74, %82 : vector<4x256xf32>
    %c0_62 = arith.constant 0 : index
    %c0_63 = arith.constant 0 : index
    %84 = vector.load %arg5[%c0_62, %c0_63] : memref<4x1xf32, #tpu.memory_space<vmem>>, vector<4x1xf32>
    %85 = vector.broadcast %84 : vector<4x1xf32> to vector<4x256xf32>
    %86 = arith.addf %83, %85 : vector<4x256xf32>
    %cst_64 = arith.constant 0.000000e+00 : f32
    %87 = vector.broadcast %cst_64 : f32 to vector<4x256xf32>
    %88 = arith.maximumf %86, %87 : vector<4x256xf32>
    %89 = arith.truncf %88 : vector<4x256xf32> to vector<4x256xbf16>
    %c4_65 = arith.constant 4 : index
    %c0_66 = arith.constant 0 : index
    %c0_67 = arith.constant 0 : index
    %90 = vector.load %arg6[%c4_65, %c0_66, %c0_67] : memref<9x4x4xbf16, #tpu.memory_space<vmem>>, vector<1x4x4xbf16>
    %91 = vector.shape_cast %90 : vector<1x4x4xbf16> to vector<4x4xbf16>
    %cst_68 = arith.constant dense<0.000000e+00> : vector<4x256xf32>
    %92 = tpu.matmul %91, %89, %cst_68 {dimension_numbers = #tpu.dot_dimension_numbers<[1], [0], [0], [1], [0, 0, 1, 1], [], []>} : vector<4x4xbf16>, vector<4x256xbf16>, vector<4x256xf32> -> vector<4x256xf32>
    %c0_69 = arith.constant 0 : index
    %c0_70 = arith.constant 0 : index
    %c0_71 = arith.constant 0 : index
    %93 = vector.load %arg6[%c0_69, %c0_70, %c0_71] : memref<9x4x4xbf16, #tpu.memory_space<vmem>>, vector<1x4x4xbf16>
    %94 = vector.shape_cast %93 : vector<1x4x4xbf16> to vector<4x4xbf16>
    %cst_72 = arith.constant dense<0.000000e+00> : vector<4x256xf32>
    %95 = tpu.matmul %94, %89, %cst_72 {dimension_numbers = #tpu.dot_dimension_numbers<[1], [0], [0], [1], [0, 0, 1, 1], [], []>} : vector<4x4xbf16>, vector<4x256xbf16>, vector<4x256xf32> -> vector<4x256xf32>
    %c17_i32_73 = arith.constant 17 : i32
    %96 = tpu.dynamic_rotate %95 by %c17_i32_73 dim 1 : vector<4x256xf32>, i32 -> vector<4x256xf32>
    %c0_74 = arith.constant 0 : index
    %c0_75 = arith.constant 0 : index
    %c0_76 = arith.constant 0 : index
    %97 = vector.load %arg3[%c0_74, %c0_75, %c0_76] : memref<8x1x256xf32, #tpu.memory_space<vmem>>, vector<1x1x256xf32>
    %98 = vector.shape_cast %97 : vector<1x1x256xf32> to vector<1x256xf32>
    %99 = vector.broadcast %98 : vector<1x256xf32> to vector<4x256xf32>
    %100 = arith.mulf %96, %99 : vector<4x256xf32>
    %101 = arith.addf %92, %100 : vector<4x256xf32>
    %c1_77 = arith.constant 1 : index
    %c0_78 = arith.constant 0 : index
    %c0_79 = arith.constant 0 : index
    %102 = vector.load %arg6[%c1_77, %c0_78, %c0_79] : memref<9x4x4xbf16, #tpu.memory_space<vmem>>, vector<1x4x4xbf16>
    %103 = vector.shape_cast %102 : vector<1x4x4xbf16> to vector<4x4xbf16>
    %cst_80 = arith.constant dense<0.000000e+00> : vector<4x256xf32>
    %104 = tpu.matmul %103, %89, %cst_80 {dimension_numbers = #tpu.dot_dimension_numbers<[1], [0], [0], [1], [0, 0, 1, 1], [], []>} : vector<4x4xbf16>, vector<4x256xbf16>, vector<4x256xf32> -> vector<4x256xf32>
    %c16_i32_81 = arith.constant 16 : i32
    %105 = tpu.dynamic_rotate %104 by %c16_i32_81 dim 1 : vector<4x256xf32>, i32 -> vector<4x256xf32>
    %c1_82 = arith.constant 1 : index
    %c0_83 = arith.constant 0 : index
    %c0_84 = arith.constant 0 : index
    %106 = vector.load %arg3[%c1_82, %c0_83, %c0_84] : memref<8x1x256xf32, #tpu.memory_space<vmem>>, vector<1x1x256xf32>
    %107 = vector.shape_cast %106 : vector<1x1x256xf32> to vector<1x256xf32>
    %108 = vector.broadcast %107 : vector<1x256xf32> to vector<4x256xf32>
    %109 = arith.mulf %105, %108 : vector<4x256xf32>
    %110 = arith.addf %101, %109 : vector<4x256xf32>
    %c2_85 = arith.constant 2 : index
    %c0_86 = arith.constant 0 : index
    %c0_87 = arith.constant 0 : index
    %111 = vector.load %arg6[%c2_85, %c0_86, %c0_87] : memref<9x4x4xbf16, #tpu.memory_space<vmem>>, vector<1x4x4xbf16>
    %112 = vector.shape_cast %111 : vector<1x4x4xbf16> to vector<4x4xbf16>
    %cst_88 = arith.constant dense<0.000000e+00> : vector<4x256xf32>
    %113 = tpu.matmul %112, %89, %cst_88 {dimension_numbers = #tpu.dot_dimension_numbers<[1], [0], [0], [1], [0, 0, 1, 1], [], []>} : vector<4x4xbf16>, vector<4x256xbf16>, vector<4x256xf32> -> vector<4x256xf32>
    %c15_i32_89 = arith.constant 15 : i32
    %114 = tpu.dynamic_rotate %113 by %c15_i32_89 dim 1 : vector<4x256xf32>, i32 -> vector<4x256xf32>
    %c2_90 = arith.constant 2 : index
    %c0_91 = arith.constant 0 : index
    %c0_92 = arith.constant 0 : index
    %115 = vector.load %arg3[%c2_90, %c0_91, %c0_92] : memref<8x1x256xf32, #tpu.memory_space<vmem>>, vector<1x1x256xf32>
    %116 = vector.shape_cast %115 : vector<1x1x256xf32> to vector<1x256xf32>
    %117 = vector.broadcast %116 : vector<1x256xf32> to vector<4x256xf32>
    %118 = arith.mulf %114, %117 : vector<4x256xf32>
    %119 = arith.addf %110, %118 : vector<4x256xf32>
    %c3_93 = arith.constant 3 : index
    %c0_94 = arith.constant 0 : index
    %c0_95 = arith.constant 0 : index
    %120 = vector.load %arg6[%c3_93, %c0_94, %c0_95] : memref<9x4x4xbf16, #tpu.memory_space<vmem>>, vector<1x4x4xbf16>
    %121 = vector.shape_cast %120 : vector<1x4x4xbf16> to vector<4x4xbf16>
    %cst_96 = arith.constant dense<0.000000e+00> : vector<4x256xf32>
    %122 = tpu.matmul %121, %89, %cst_96 {dimension_numbers = #tpu.dot_dimension_numbers<[1], [0], [0], [1], [0, 0, 1, 1], [], []>} : vector<4x4xbf16>, vector<4x256xbf16>, vector<4x256xf32> -> vector<4x256xf32>
    %c1_i32_97 = arith.constant 1 : i32
    %123 = tpu.dynamic_rotate %122 by %c1_i32_97 dim 1 : vector<4x256xf32>, i32 -> vector<4x256xf32>
    %c3_98 = arith.constant 3 : index
    %c0_99 = arith.constant 0 : index
    %c0_100 = arith.constant 0 : index
    %124 = vector.load %arg3[%c3_98, %c0_99, %c0_100] : memref<8x1x256xf32, #tpu.memory_space<vmem>>, vector<1x1x256xf32>
    %125 = vector.shape_cast %124 : vector<1x1x256xf32> to vector<1x256xf32>
    %126 = vector.broadcast %125 : vector<1x256xf32> to vector<4x256xf32>
    %127 = arith.mulf %123, %126 : vector<4x256xf32>
    %128 = arith.addf %119, %127 : vector<4x256xf32>
    %c5_101 = arith.constant 5 : index
    %c0_102 = arith.constant 0 : index
    %c0_103 = arith.constant 0 : index
    %129 = vector.load %arg6[%c5_101, %c0_102, %c0_103] : memref<9x4x4xbf16, #tpu.memory_space<vmem>>, vector<1x4x4xbf16>
    %130 = vector.shape_cast %129 : vector<1x4x4xbf16> to vector<4x4xbf16>
    %cst_104 = arith.constant dense<0.000000e+00> : vector<4x256xf32>
    %131 = tpu.matmul %130, %89, %cst_104 {dimension_numbers = #tpu.dot_dimension_numbers<[1], [0], [0], [1], [0, 0, 1, 1], [], []>} : vector<4x4xbf16>, vector<4x256xbf16>, vector<4x256xf32> -> vector<4x256xf32>
    %c255_i32_105 = arith.constant 255 : i32
    %132 = tpu.dynamic_rotate %131 by %c255_i32_105 dim 1 : vector<4x256xf32>, i32 -> vector<4x256xf32>
    %c4_106 = arith.constant 4 : index
    %c0_107 = arith.constant 0 : index
    %c0_108 = arith.constant 0 : index
    %133 = vector.load %arg3[%c4_106, %c0_107, %c0_108] : memref<8x1x256xf32, #tpu.memory_space<vmem>>, vector<1x1x256xf32>
    %134 = vector.shape_cast %133 : vector<1x1x256xf32> to vector<1x256xf32>
    %135 = vector.broadcast %134 : vector<1x256xf32> to vector<4x256xf32>
    %136 = arith.mulf %132, %135 : vector<4x256xf32>
    %137 = arith.addf %128, %136 : vector<4x256xf32>
    %c6_109 = arith.constant 6 : index
    %c0_110 = arith.constant 0 : index
    %c0_111 = arith.constant 0 : index
    %138 = vector.load %arg6[%c6_109, %c0_110, %c0_111] : memref<9x4x4xbf16, #tpu.memory_space<vmem>>, vector<1x4x4xbf16>
    %139 = vector.shape_cast %138 : vector<1x4x4xbf16> to vector<4x4xbf16>
    %cst_112 = arith.constant dense<0.000000e+00> : vector<4x256xf32>
    %140 = tpu.matmul %139, %89, %cst_112 {dimension_numbers = #tpu.dot_dimension_numbers<[1], [0], [0], [1], [0, 0, 1, 1], [], []>} : vector<4x4xbf16>, vector<4x256xbf16>, vector<4x256xf32> -> vector<4x256xf32>
    %c241_i32_113 = arith.constant 241 : i32
    %141 = tpu.dynamic_rotate %140 by %c241_i32_113 dim 1 : vector<4x256xf32>, i32 -> vector<4x256xf32>
    %c5_114 = arith.constant 5 : index
    %c0_115 = arith.constant 0 : index
    %c0_116 = arith.constant 0 : index
    %142 = vector.load %arg3[%c5_114, %c0_115, %c0_116] : memref<8x1x256xf32, #tpu.memory_space<vmem>>, vector<1x1x256xf32>
    %143 = vector.shape_cast %142 : vector<1x1x256xf32> to vector<1x256xf32>
    %144 = vector.broadcast %143 : vector<1x256xf32> to vector<4x256xf32>
    %145 = arith.mulf %141, %144 : vector<4x256xf32>
    %146 = arith.addf %137, %145 : vector<4x256xf32>
    %c7_117 = arith.constant 7 : index
    %c0_118 = arith.constant 0 : index
    %c0_119 = arith.constant 0 : index
    %147 = vector.load %arg6[%c7_117, %c0_118, %c0_119] : memref<9x4x4xbf16, #tpu.memory_space<vmem>>, vector<1x4x4xbf16>
    %148 = vector.shape_cast %147 : vector<1x4x4xbf16> to vector<4x4xbf16>
    %cst_120 = arith.constant dense<0.000000e+00> : vector<4x256xf32>
    %149 = tpu.matmul %148, %89, %cst_120 {dimension_numbers = #tpu.dot_dimension_numbers<[1], [0], [0], [1], [0, 0, 1, 1], [], []>} : vector<4x4xbf16>, vector<4x256xbf16>, vector<4x256xf32> -> vector<4x256xf32>
    %c240_i32_121 = arith.constant 240 : i32
    %150 = tpu.dynamic_rotate %149 by %c240_i32_121 dim 1 : vector<4x256xf32>, i32 -> vector<4x256xf32>
    %c6_122 = arith.constant 6 : index
    %c0_123 = arith.constant 0 : index
    %c0_124 = arith.constant 0 : index
    %151 = vector.load %arg3[%c6_122, %c0_123, %c0_124] : memref<8x1x256xf32, #tpu.memory_space<vmem>>, vector<1x1x256xf32>
    %152 = vector.shape_cast %151 : vector<1x1x256xf32> to vector<1x256xf32>
    %153 = vector.broadcast %152 : vector<1x256xf32> to vector<4x256xf32>
    %154 = arith.mulf %150, %153 : vector<4x256xf32>
    %155 = arith.addf %146, %154 : vector<4x256xf32>
    %c8_125 = arith.constant 8 : index
    %c0_126 = arith.constant 0 : index
    %c0_127 = arith.constant 0 : index
    %156 = vector.load %arg6[%c8_125, %c0_126, %c0_127] : memref<9x4x4xbf16, #tpu.memory_space<vmem>>, vector<1x4x4xbf16>
    %157 = vector.shape_cast %156 : vector<1x4x4xbf16> to vector<4x4xbf16>
    %cst_128 = arith.constant dense<0.000000e+00> : vector<4x256xf32>
    %158 = tpu.matmul %157, %89, %cst_128 {dimension_numbers = #tpu.dot_dimension_numbers<[1], [0], [0], [1], [0, 0, 1, 1], [], []>} : vector<4x4xbf16>, vector<4x256xbf16>, vector<4x256xf32> -> vector<4x256xf32>
    %c239_i32_129 = arith.constant 239 : i32
    %159 = tpu.dynamic_rotate %158 by %c239_i32_129 dim 1 : vector<4x256xf32>, i32 -> vector<4x256xf32>
    %c7_130 = arith.constant 7 : index
    %c0_131 = arith.constant 0 : index
    %c0_132 = arith.constant 0 : index
    %160 = vector.load %arg3[%c7_130, %c0_131, %c0_132] : memref<8x1x256xf32, #tpu.memory_space<vmem>>, vector<1x1x256xf32>
    %161 = vector.shape_cast %160 : vector<1x1x256xf32> to vector<1x256xf32>
    %162 = vector.broadcast %161 : vector<1x256xf32> to vector<4x256xf32>
    %163 = arith.mulf %159, %162 : vector<4x256xf32>
    %164 = arith.addf %155, %163 : vector<4x256xf32>
    %c0_133 = arith.constant 0 : index
    %c0_134 = arith.constant 0 : index
    %165 = vector.load %arg7[%c0_133, %c0_134] : memref<4x1xf32, #tpu.memory_space<vmem>>, vector<4x1xf32>
    %166 = vector.broadcast %165 : vector<4x1xf32> to vector<4x256xf32>
    %167 = arith.addf %164, %166 : vector<4x256xf32>
    %cst_135 = arith.constant 0.000000e+00 : f32
    %168 = vector.broadcast %cst_135 : f32 to vector<4x256xf32>
    %169 = arith.maximumf %167, %168 : vector<4x256xf32>
    %c0_136 = arith.constant 0 : index
    %c0_137 = arith.constant 0 : index
    %170 = vector.load %arg8[%c0_136, %c0_137] : memref<2x4xbf16, #tpu.memory_space<vmem>>, vector<2x4xbf16>
    %171 = arith.truncf %169 : vector<4x256xf32> to vector<4x256xbf16>
    %cst_138 = arith.constant dense<0.000000e+00> : vector<2x256xf32>
    %172 = tpu.matmul %170, %171, %cst_138 {dimension_numbers = #tpu.dot_dimension_numbers<[1], [0], [0], [1], [0, 0, 1, 1], [], []>} : vector<2x4xbf16>, vector<4x256xbf16>, vector<2x256xf32> -> vector<2x256xf32>
    %c0_139 = arith.constant 0 : index
    %c0_140 = arith.constant 0 : index
    %173 = vector.load %arg9[%c0_139, %c0_140] : memref<2x1xf32, #tpu.memory_space<vmem>>, vector<2x1xf32>
    %174 = vector.broadcast %173 : vector<2x1xf32> to vector<2x256xf32>
    %175 = arith.addf %172, %174 : vector<2x256xf32>
    %c0_141 = arith.constant 0 : index
    %c0_142 = arith.constant 0 : index
    %c0_143 = arith.constant 0 : index
    %176 = vector.load %arg10[%c0_141, %c0_142, %c0_143] : memref<1x2x256xf32, #tpu.memory_space<vmem>>, vector<1x2x256xf32>
    %177 = vector.shape_cast %176 : vector<1x2x256xf32> to vector<2x256xf32>
    %178 = vector.shape_cast %175 : vector<2x256xf32> to vector<1x2x256xf32>
    tpu.vector_store %arg10[%c0_141, %c0_142, %c0_143], %178 {strides = array<i32>} : memref<1x2x256xf32, #tpu.memory_space<vmem>>, vector<1x2x256xf32>,
    return
  }
  func.func @transform_0(%arg0: i32) -> (i32, i32, i32) {
    %c0_i32 = arith.constant 0 : i32
    %c0_i32_0 = arith.constant 0 : i32
    %c0_i32_1 = arith.constant 0 : i32
    return %arg0, %c0_i32, %c0_i32_0 : i32, i32, i32
  }
  func.func @transform_1(%arg0: i32) -> (i32, i32, i32) {
    %c0_i32 = arith.constant 0 : i32
    %c0_i32_0 = arith.constant 0 : i32
    %c0_i32_1 = arith.constant 0 : i32
    return %arg0, %c0_i32, %c0_i32_0 : i32, i32, i32
  }
  func.func @transform_2(%arg0: i32) -> (i32, i32, i32) {
    %c0_i32 = arith.constant 0 : i32
    %c0_i32_0 = arith.constant 0 : i32
    %c0_i32_1 = arith.constant 0 : i32
    %c0_i32_2 = arith.constant 0 : i32
    return %c0_i32, %c0_i32_0, %c0_i32_1 : i32, i32, i32
  }
  func.func @transform_3(%arg0: i32) -> (i32, i32, i32) {
    %c0_i32 = arith.constant 0 : i32
    %c0_i32_0 = arith.constant 0 : i32
    %c0_i32_1 = arith.constant 0 : i32
    %c0_i32_2 = arith.constant 0 : i32
    return %c0_i32, %c0_i32_0, %c0_i32_1 : i32, i32, i32
  }
  func.func @transform_4(%arg0: i32) -> (i32, i32) {
    %c0_i32 = arith.constant 0 : i32
    %c0_i32_0 = arith.constant 0 : i32
    %c0_i32_1 = arith.constant 0 : i32
    return %c0_i32, %c0_i32_0 : i32, i32
  }
  func.func @transform_5(%arg0: i32) -> (i32, i32, i32) {
    %c0_i32 = arith.constant 0 : i32
    %c0_i32_0 = arith.constant 0 : i32
    %c0_i32_1 = arith.constant 0 : i32
    %c0_i32_2 = arith.constant 0 : i32
    return %c0_i32, %c0_i32_0, %c0_i32_1 : i32, i32, i32
  }
  func.func @transform_6(%arg0: i32) -> (i32, i32) {
    %c0_i32 = arith.constant 0 : i32
    %c0_i32_0 = arith.constant 0 : i32
    %c0_i32_1 = arith.constant 0 : i32
    return %c0_i32, %c0_i32_0 : i32, i32
  }
  func.func @transform_7(%arg0: i32) -> (i32, i32) {
    %c0_i32 = arith.constant 0 : i32
    %c0_i32_0 = arith.constant 0 : i32
    %c0_i32_1 = arith.constant 0 : i32
    return %c0_i32, %c0_i32_0 : i32, i32
  }
  func.func @transform_8(%arg0: i32) -> (i32, i32) {
    %c0_i32 = arith.constant 0 : i32
    %c0_i32_0 = arith.constant 0 : i32
    %c0_i32_1 = arith.constant 0 : i32
    return %c0_i32, %c0_i32_0 : i32, i32
  }
  func.func @transform_9(%arg0: i32) -> (i32, i32, i32) {
    %c0_i32 = arith.constant 0 : i32
    %c0_i32_0 = arith.constant 0 : i32
    %c0_i32_1 = arith.constant 0 : i32
    return %arg0, %c0_i32, %c0_i32_0 : i32, i32, i32
  }
}

</mosaic_0001>

<bundles_post_ra>
// kernel: tpu_custom_call.1
= control target key start
LH: loop header
LB: loop body
LE: loop exit
PB: predicated region body
PF: predicated region fallthrough
CT: control target
= control target key end

     0   :  { %14 = vsyncpa [#allocation4], 0  ;;  %s2620_s0 = inlined_call_operand.hbm [shape: f32[2,4,256], index: 0, kind: input, shape index: {}]   ;;  %s2621_s1 = inlined_call_operand.vmem [shape: f32[2,8,256], index: 1, kind: input, shape index: {}]   ;;  %s2622_s2 = inlined_call_operand.hbm [shape: f32[8,1,256], index: 2, kind: input, shape index: {}]   ;;  %s2623_s3 = inlined_call_operand.vmem [shape: bf16[9,4,12], index: 3, kind: input, shape index: {}]   ;;  %s2624_s4 = inlined_call_operand.vmem [shape: f32[4,1], index: 4, kind: input, shape index: {}]   ;;  %s2625_s5 = inlined_call_operand.vmem [shape: bf16[9,4,4], index: 5, kind: input, shape index: {}]   ;;  %s2626_s6 = inlined_call_operand.vmem [shape: f32[4,1], index: 6, kind: input, shape index: {}]   ;;  %s2627_s7 = inlined_call_operand.vmem [shape: bf16[2,4], index: 7, kind: input, shape index: {}]   ;;  %s2628_s8 = inlined_call_operand.vmem [shape: f32[2,1], index: 8, kind: input, shape index: {}]   ;;  %s2629_s9 = inlined_call_operand.hbm [shape: f32[2,2,256], index: 9, kind: output, shape index: {}]  }
   0x1   :  { %16 = vsyncpa [#allocation4 + $0x1], 0 }
   0x2   :  { %17 = vsyncpa [#allocation7], 0 }
   0x3   :  { %18 = vsyncpa [#allocation5], 0 }
   0x4   :  { %20 = vsyncpa [#allocation5 + $0x1], 0  ;;  %s2084_s30 = smov 0   ;;  %s2086_s10 = smov 0  }
   0x5   :  { %s2088_s11 = smov 0   ;;  %s2090_s12 = smov 0  }
   0x6 LB: > { %s2105_s13 = sadd.s32 4294967295, %s2018_s12   ;;  %s1734_s14 = sadd.s32 4294967294, %s2018_s12   ;;  %s2018_s12 = sphi %s2090_s12, %s2655_s12   ;;  %s2014_s11 = sphi %s2088_s11, %s2658_s11   ;;  %s2010_s10 = sphi %s2086_s10, %s2657_s10   ;;  %s2006_s30 = sphi %s2084_s30, %s2656_s30  }
   0x7   : > { %p46_p0 = scmp.ne.s32.totalorder %s2010_s10, %s2006_s30  ;;  %p2630_p1 = scmp.eq.s32.totalorder %s2105_s13, 0 }
   0x8   : > { %p249_p3 = scmp.eq.s32.totalorder %s1734_s14, 1  ;;  %p1735_p5 = scmp.ge.s32.totalorder %s2018_s12, 1 }
   0x9   : > { %p2114_p4 = por %p2630_p1, %p46_p0  ;;  %p256_p7 = scmp.lt.s32.totalorder %s2018_s12, 3 }
   0xa   : > { %p2119_p6 = por %p249_p3, %p46_p0  ;;  %s2020_s18 = smov [#allocation6]  }
   0xb   : > { %s2638_s15 = scalar_select %p2114_p4, 1, 0 }
   0xc   : > { %s2639_s16 = scalar_select %p2119_p6, 1, 0 }
   0xd   : > { %p2124_p8 = pnand %p1735_p5, %p256_p7  ;;  %s268_s19 = sshll.u32 %s2020_s18, 4  ;;  %s2128_s19 = int_to_ptr.vmem [resolvable:$true] %s268_s19 }
   0xe   : > { %2640 = sst [smem:[#allocation12_spill]] %s2639_s16  ;;  %s2140_s21 = sadd.s32 1, %s2018_s12  }
   0xf   : > { %s2641_s17 = scalar_select %p2124_p8, 1, 0 }
  0x10   : > { %p1824_p9 = pneg %p2124_p8  ;;  %2643 = sst [smem:[#allocation13_spill]] %s2140_s21 }
  0x11   : > { %s33_s22 = sadd.s32 1, %s2014_s11  ;;  %s30_s23 = ssub.s32 %s2018_s12, %s2140_s21 }
  0x12   : > { %p2135_p11 = pnand %p1824_p9, %p2630_p1  ;;  %s1890_s26 = scalar_lea.hbm %s2622_s2, 256 }
  0x13   : > { %p1891_p12 = scmp.ne.s32.totalorder %s2622_s2, %s1890_s26  ;;  %p1897_p5 = scmp.lt.u32.totalorder %s1890_s26, %s2622_s2 }
  0x14   : > { %p1892_p13 = pneg %p2135_p11 }
  0x16   : > { %p1893_p0 = pnand %p1892_p13, %p1891_p12 }
  0x18   : > { %p1894_p3 = pneg %p1893_p0 }
  0x1a   : > { %p1899_p7 = pnand %p1897_p5, %p1894_p3 }
  0x1c   : > { %1902 = shalt.err (!%p1899_p7)
}
  0x1d   : > { %s1903_s18 = scalar_lea.vmem %s2128_s19, 256  ;;  %p1911_p2 = scmp.lt.s32.totalorder %s2128_s19, %s2128_s19 }
  0x1e   : > { %p1904_p9 = scmp.ne.s32.totalorder %s2128_s19, %s1903_s18  ;;  %p1912_p6 = scmp.lt.s32.totalorder %s1903_s18, %s1903_s18 }
  0x20   : > { %p1906_p10 = pnand %p1904_p9, %p1892_p13  ;;  %p1913_p4 = por %p1912_p6, %p1911_p2 }
  0x22   : > { %p1907_p1 = pneg %p1906_p10 }
  0x24   : > { %p1914_p8 = pnand %p1913_p4, %p1907_p1 }
  0x26   : > { %1917 = shalt.err (!%p1914_p8)
}
  0x27   : > { %s2021_s24 = smov 32   ;;  %s2022_s25 = smov 2  }
  0x28   : > { %1827 = dma.hbm_to_vmem [thread:$0]  (!%p2135_p11), %s2622_s2, 256, %s2128_s19, [#allocation7], %s2021_s24, %s2021_s24, %s2022_s25  }
  0x29   : > { %p31_p2 = scmp.eq.s32.totalorder %s30_s23, 0  ;;  %p40_p1 = scmp.ne.s32.totalorder %s2014_s11, %s2010_s10 }
  0x2a   : > { %p41_p4 = scmp.eq.s32.totalorder %s2018_s12, 0  ;;  %p1837_p6 = scmp.lt.s32.totalorder %s2018_s12, 2 }
  0x2b   : > { %s2171_s28 = scalar_select %p31_p2, %s2014_s11, %s33_s22  }
  0x2c   : > { %p42_p8 = por %p41_p4, %p40_p1  ;;  %p2644_p10 = scmp.eq.s32.totalorder %s2105_s13, 1 }
  0x2d   : > { %s300_s14 = sand.u32 1, %s2014_s11   ;;  %s1811_s18 = sshll.u32 %s2018_s12, 7 }
  0x2e   : > { %p2175_p12 = por %p2644_p10, %p40_p1  ;;  %s1738_s21 = sshll.u32 %s300_s14, 3 }
  0x2f   : > { %s2184_s26 = scalar_lea.hbm %s2620_s0, %s1811_s18  ;;  %s304_s19 = scalar_lea.vmem [#allocation3], %s1738_s21 }
  0x30   : > { %s312_s22 = sshll.u32 %s304_s19, 4  ;;  %p2186_p11 = pnand %p1837_p6, %p42_p8  ;;  %s2190_s22 = int_to_ptr.vmem [resolvable:$true] %s312_s22 }
  0x31   : > { %s301_s24 = scalar_lea.sflag [#allocation4], %s300_s14  ;;  %s1918_s25 = scalar_lea.hbm %s2184_s26, 128 }
  0x32   : > { %p1919_p13 = scmp.ne.s32.totalorder %s2184_s26, %s1918_s25  ;;  %p1920_p0 = pneg %p2186_p11 }
  0x33   : > { %s1923_s27 = scalar_lea.hbm %s2620_s0, 256  ;;  %p1924_p7 = scmp.lt.u32.totalorder %s2184_s26, %s2620_s0 }
  0x34   : > { %p1921_p3 = pnand %p1920_p0, %p1919_p13  ;;  %p1925_p9 = scmp.lt.u32.totalorder %s1923_s27, %s1918_s25 }
  0x35   : > { %p1927_p1 = scmp.lt.u32.totalorder %s1918_s25, %s2184_s26 }
  0x36   : > { %p1922_p5 = pneg %p1921_p3  ;;  %p1926_p2 = por %p1925_p9, %p1924_p7 }
  0x38   : > { %p1928_p4 = por %p1927_p1, %p1926_p2 }
  0x3a   : > { %p1929_p6 = pnand %p1928_p4, %p1922_p5 }
  0x3c   : > { %1932 = shalt.err (!%p1929_p6)
}
  0x3d   : > { %s1933_s14 = scalar_lea.vmem %s2190_s22, 128  ;;  %s2023_s19 = smov [#allocation3]  }
  0x3e   : > { %p1934_p8 = scmp.ne.s32.totalorder %s2190_s22, %s1933_s14  ;;  %s1938_s16 = sshll.u32 %s2023_s19, 4  ;;  %s1939_s16 = int_to_ptr.vmem [resolvable:$false] %s1938_s16 }
  0x3f   : > { %s1940_s21 = scalar_lea.vmem %s1939_s16, 256  ;;  %p1941_p3 = scmp.lt.s32.totalorder %s2190_s22, %s1939_s16 }
  0x40   : > { %p1936_p10 = pnand %p1934_p8, %p1920_p0  ;;  %p1942_p7 = scmp.lt.s32.totalorder %s1940_s21, %s1933_s14 }
  0x42   : > { %p1937_p13 = pneg %p1936_p10  ;;  %p1943_p9 = por %p1942_p7, %p1941_p3 }
  0x44   : > { %p1944_p2 = pnand %p1943_p9, %p1937_p13 }
  0x46   : > { %1947 = shalt.err (!%p1944_p2)
}
  0x47   : > { %1831 = dma.hbm_to_vmem [thread:$0]  (!%p2186_p11), %s2184_s26, 128, %s2190_s22, %s301_s24  }
  0x48   : > { %p2647_p5 = scmp.ne.s32.totalorder %s2641_s17, 0 }
  0x49   : > { %s2220_s25 = sand.u32 (!%p2647_p5), 1, %s2010_s10   ;;  %p2648_p0 = scmp.ne.s32.totalorder (!%p2647_p5), %s2638_s15, 0 }
  0x4a   : > { %329 = sbr.rel (%p2647_p5) target bundleno = 1098 (0x44a), region = 56  ;;  %s1742_s27 = sshll.u32 (!%p2647_p5), %s2220_s25, 3 }
  0x4b   : > { %s332_s18 = scalar_lea.sflag (!%p2647_p5), [#allocation4], %s2220_s25  ;;  %s335_s20 = scalar_lea.vmem (!%p2647_p5), [#allocation3], %s1742_s27 }
  0x51   : > { %1993 = dma.done.wait (%p2648_p0), %s332_s18, 128  }
  0x52   : > { %1995 = vsyncadd (%p2648_p0), %s332_s18, 4294967168  ;;  %p2649_p1 = scmp.eq.s32.totalorder %s2105_s13, 0 }
  0x54   : > { %1997 = dma.done.wait (%p2649_p1), [#allocation7], 256   ;;  %p2650_p11 = pmov %p2649_p1 }
  0x55   : > { %p379_p4 = scmp.lt.s32.totalorder %s2105_s13, 1  ;;  %v2024_v0 = vmov 0   ;;  %v385_v1 = vld [vmem:[%s335_s20] sm:$0xff]  ;;  %vm430_vm0 = vcmask 1045504   ;;  %v417_v12 = vld [vmem:[%s2623_s3] sm:$0x3]  ;;  %v482_v62 = vlaneseq }
  0x56   : > { %1999 = vsyncadd (%p2650_p11), [#allocation7], 4294967040  ;;  %469 = vmatprep.mubr.bf16.mxu0 %v2024_v0  ;;  %536 = vmatprep.mubr.bf16.mxu1 %v2024_v0  ;;  %v387_v4 = vcombine.high %v385_v1, %v385_v1  ;;  %vm426_vm1 = vcmask 97280   ;;  %v1749_v13 = vld [vmem:[%s2623_s3 + $0x8] sm:$0x3]  ;;  %s2025_s27 = smov 17  }
  0x57   : > { %s380_s17 = scalar_select %p379_p4, %s2105_s13, 1  ;;  %1884 = vset.pattern.permute.xlu0 %v2024_v0  ;;  %1885 = vset.pattern.permute.xlu1 %v2024_v0  ;;  %v1756_v14 = vld [vmem:[%s2623_s3 + $0x2] sm:$0x3]  ;;  %v1759_v15 = vld [vmem:[%s2623_s3 + $0x4] sm:$0x3]  ;;  %vm1054_vm10 = vcmask 1041408  }
  0x58   : > { %v1813_v6 = vpack.c.bf16 %v387_v4, %v385_v1  ;;  %v1762_v16 = vld [vmem:[%s2623_s3 + $0x6] sm:$0x3]  ;;  %v1765_v17 = vld [vmem:[%s2623_s3 + $0xa] sm:$0x3]  ;;  %v1768_v18 = vld [vmem:[%s2623_s3 + $0xc] sm:$0x3] }
  0x59   : > { %s1812_s15 = sshll.u32 %s380_s17, 4  ;;  %v1771_v19 = vld [vmem:[%s2623_s3 + $0xe] sm:$0x3]  ;;  %v1774_v20 = vld [vmem:[%s2623_s3 + $0x10] sm:$0x3]  ;;  %s2026_s18 = smov 16  }
  0x5a   : > { %s383_s23 = scalar_lea.vmem %s2621_s1, %s1812_s15  ;;  %397 = vst [vmem:[#allocation2] sm:$0x33] %v1813_v6  ;;  %s2027_s20 = smov 15   ;;  %v1035_v53 = vld [vmem:[%s2624_s4] sm:$0xf]  ;;  %vm1050_vm11 = vcmask 31744  }
  0x5b   : > { %v398_v2 = vld [vmem:[%s383_s23] sm:$0xff]  ;;  %v399_v3 = vld [vmem:[%s383_s23 + $0x8] sm:$0xff]  ;;  %s2028_s17 = smov 1   ;;  %s2029_s15 = smov 127  }
  0x5c   : > { %v1814_v5 = vpack.c.bf16 %v399_v3, %v398_v2  ;;  %s2030_s26 = smov 113   ;;  %s2031_s22 = smov 112   ;;  %v1546_v57 = vld [vmem:[%s2626_s6] sm:$0xf]  ;;  %v490_v2 = vshrl.u32 %v482_v62, 7  ;;  %v2322_v3 = vand.u32 127, %v482_v62 }
  0x5d   : > { %s2636_s16 = smov 111   ;;  %s1628_s23 = scalar_lea.sflag [#allocation5], %s2220_s25 }
  0x5e   : > { %v407_v7 = vrot.slane %v1814_v5, 6  ;;  %v2324_v6 = vsub.s32 0, %v490_v2  ;;  %vm484_vm2 = vcmp.lt.s32.totalorder %v2322_v3, 17  ;;  %vm595_vm3 = vcmp.lt.s32.totalorder %v2322_v3, 16 }
  0x5f   : > { %vm665_vm4 = vcmp.lt.s32.totalorder %v2322_v3, 15  ;;  %vm735_vm5 = vcmp.lt.s32.totalorder %v2322_v3, 1  ;;  %vm805_vm6 = vcmp.lt.s32.totalorder %v2322_v3, 127  ;;  %vm875_vm7 = vcmp.lt.s32.totalorder %v2322_v3, 113 }
  0x60   : > { %v408_v8 = vrot.slane %v407_v7, 4  ;;  %411 = vst [vmem:[#allocation2] sm:$0xcc] %v407_v7  ;;  %v2326_v7 = vsub.s32 1, %v490_v2  ;;  %vm945_vm8 = vcmp.lt.s32.totalorder %v2322_v3, 112  ;;  %vm1015_vm9 = vcmp.lt.s32.totalorder %v2322_v3, 111 }
  0x62   : > { %412 = vst [vmem:[#allocation2 + $0x8] sm:$0x33] %v408_v8  ;;  %v487_v8 = vld [vmem:[#allocation6] sm:$0x3] }
  0x69   : > { %v1887_v9 = vld [vmem:[#allocation2 + $0x4] ss:$8 sps:$4 sm:$0x3f]   ;;  %v1889_v10 = vld [vmem:[#allocation2] ss:$8 sps:$4 sm:$0x3f]  }
  0x6a   : > { %1752 = vmatprep.subr.msk.bf16.mxu0 %vm430_vm0, %v1887_v9  ;;  %1754 = vmatprep.subr.msk.bf16.mxu1 %vm430_vm0, %v1887_v9  ;;  %v432_v11 = vsel %vm430_vm0, %v1889_v10, 0  ;;  %v599_v10 = vld [vmem:[#allocation6 + $0x2] sm:$0x3] }
  0x6b   : > { %438 = vmatpush1.bf16.msra.mxu0 %v432_v11  ;;  %505 = vmatpush1.bf16.msra.mxu1 %v432_v11 }
  0x6c   : > { %1757 = vmatprep.subr.msk.bf16.mxu0 %vm430_vm0, %v1887_v9  ;;  %1760 = vmatprep.subr.msk.bf16.mxu1 %vm430_vm0, %v1887_v9 }
  0x6e   : > { %1753 = vmatmul.mubr.msk.bf16.vlgmr.msra.gmra.mrb[0].mxu0 %vm426_vm1, %v417_v12  ;;  %1755 = vmatmul.mubr.msk.bf16.vlgmr.msra.gmra.mrb[0].mxu1 %vm426_vm1, %v1749_v13  ;;  %v2333_v12 = vrot.slane %v487_v8, %v2326_v7  ;;  %v669_v13 = vld [vmem:[#allocation6 + $0x4] sm:$0x3] }
  0x6f   : > { %551 = vmatpush1.bf16.msra.mxu0 %v432_v11  ;;  %621 = vmatpush1.bf16.msra.mxu1 %v432_v11 }
  0x70   : > { %582 = vmatprep.mubr.bf16.mxu0 %v2024_v0  ;;  %652 = vmatprep.mubr.bf16.mxu1 %v2024_v0 }
  0x71   : > { %1763 = vmatprep.subr.msk.bf16.mxu0 %vm430_vm0, %v1887_v9  ;;  %1766 = vmatprep.subr.msk.bf16.mxu1 %vm430_vm0, %v1887_v9 }
  0x76   : > { %1758 = vmatmul.mubr.msk.bf16.vlgmr.msra.gmra.mrb[4].mxu0 %vm426_vm1, %v1756_v14  ;;  %1761 = vmatmul.mubr.msk.bf16.vlgmr.msra.gmra.mrb[4].mxu1 %vm426_vm1, %v1759_v15 }
  0x77   : > { %691 = vmatpush1.bf16.msra.mxu0 %v432_v11  ;;  %761 = vmatpush1.bf16.msra.mxu1 %v432_v11 }
  0x78   : > { %722 = vmatprep.mubr.bf16.mxu0 %v2024_v0  ;;  %792 = vmatprep.mubr.bf16.mxu1 %v2024_v0 }
  0x79   : > { %1769 = vmatprep.subr.msk.bf16.mxu0 %vm430_vm0, %v1887_v9  ;;  %1772 = vmatprep.subr.msk.bf16.mxu1 %vm430_vm0, %v1887_v9 }
  0x7e   : > { %1764 = vmatmul.mubr.msk.bf16.vlgmr.msra.gmra.mrb[8].mxu0 %vm426_vm1, %v1762_v16  ;;  %1767 = vmatmul.mubr.msk.bf16.vlgmr.msra.gmra.mrb[8].mxu1 %vm426_vm1, %v1765_v17  ;;  %v739_v17 = vld [vmem:[#allocation6 + $0x6] sm:$0x3] }
  0x7f   : > { %831 = vmatpush1.bf16.msra.mxu0 %v432_v11  ;;  %901 = vmatpush1.bf16.msra.mxu1 %v432_v11 }
  0x80   : > { %862 = vmatprep.mubr.bf16.mxu0 %v2024_v0  ;;  %932 = vmatprep.mubr.bf16.mxu1 %v2024_v0 }
  0x81   : > { %1775 = vmatprep.subr.msk.bf16.mxu0 %vm430_vm0, %v1887_v9 }
  0x86   : > { %1770 = vmatmul.mubr.msk.bf16.vlgmr.msra.gmra.mrb[12].mxu0 %vm426_vm1, %v1768_v18  ;;  %1773 = vmatmul.mubr.msk.bf16.vlgmr.msra.gmra.mrb[12].mxu1 %vm426_vm1, %v1771_v19  ;;  %v2341_v18 = vrot.slane %v599_v10, %v2324_v6  ;;  %v2344_v19 = vrot.slane %v599_v10, %v2326_v7 }
  0x87   : > { %971 = vmatpush1.bf16.msra.mxu0 %v432_v11  ;;  %1002 = vmatprep.mubr.bf16.mxu0 %v2024_v0  ;;  %v2330_v11 = vrot.slane %v487_v8, %v2324_v6 }
  0x88   : > { %1093 = vmatprep.mubr.bf16.mxu1 %v2024_v0 }
  0x8e   : > { %1776 = vmatmul.mubr.msk.bf16.vlgmr.msra.gmra.mrb[16].mxu0 %vm426_vm1, %v1774_v20 }
  0x8f   : > { %1145 = vmatprep.mubr.bf16.mxu0 %v2024_v0 }
 0x141   : > { %v471_v21 = vpop.f32.mrb[0].mxu0  ;;  %v2296_v22 = vpop.f32.mrb[0].mxu1 }
 0x142   : > { %478 = vrot.lane.b32.xlu0 %v471_v21, %s2025_s27  ;;  %v473_v23 = vpop.f32.mrb[1].mxu0  ;;  %v2299_v24 = vpop.f32.mrb[1].mxu1 }
 0x143   : > { %v475_v25 = vpop.f32.mrb[2].mxu0  ;;  %v542_v26 = vpop.f32.mrb[2].mxu1 }
 0x144   : > { %v476_v27 = vpop.f32.mrb[3].mxu0  ;;  %v543_v28 = vpop.f32.mrb[3].mxu1  ;;  %v2352_v25 = vrot.slane %v669_v13, %v2324_v6  ;;  %v2355_v26 = vrot.slane %v669_v13, %v2326_v7 }
 0x145   : > { %v809_v27 = vld [vmem:[#allocation6 + $0x8] sm:$0x3] }
 0x146   : > { %480 = vrot.lane.b32.xlu0 %v473_v23, %s2025_s27 }
 0x149   : > { %v584_v29 = vpop.f32.mrb[4].mxu0  ;;  %v654_v30 = vpop.f32.mrb[4].mxu1 }
 0x14a   : > { %591 = vrot.lane.b32.xlu1 %v584_v29, %s2026_s18  ;;  %v586_v31 = vpop.f32.mrb[5].mxu0  ;;  %v656_v32 = vpop.f32.mrb[5].mxu1  ;;  %661 = vrot.lane.b32.xlu0 %v654_v30, %s2027_s20  ;;  %v2361_v30 = vrot.slane %v739_v17, %v2324_v6 }
 0x14b   : > { %v588_v33 = vpop.f32.mrb[6].mxu0  ;;  %v658_v34 = vpop.f32.mrb[6].mxu1 }
 0x14c   : > { %v589_v35 = vpop.f32.mrb[7].mxu0  ;;  %v659_v36 = vpop.f32.mrb[7].mxu1  ;;  %v2368_v34 = vrot.slane %v739_v17, %v2326_v7 }
 0x14e   : > { %593 = vrot.lane.b32.xlu1 %v586_v31, %s2026_s18  ;;  %v879_v31 = vld [vmem:[#allocation6 + $0xa] sm:$0x3] }
 0x151   : > { %v724_v37 = vpop.f32.mrb[8].mxu0  ;;  %v794_v38 = vpop.f32.mrb[8].mxu1 }
 0x152   : > { %663 = vrot.lane.b32.xlu1 %v656_v32, %s2027_s20  ;;  %731 = vrot.lane.b32.xlu0 %v724_v37, %s2028_s17  ;;  %v726_v39 = vpop.f32.mrb[9].mxu0  ;;  %v796_v40 = vpop.f32.mrb[9].mxu1  ;;  %v2374_v37 = vrot.slane %v809_v27, %v2324_v6 }
 0x153   : > { %v728_v41 = vpop.f32.mrb[10].mxu0  ;;  %v798_v42 = vpop.f32.mrb[10].mxu1 }
 0x154   : > { %v729_v43 = vpop.f32.mrb[11].mxu0  ;;  %v799_v44 = vpop.f32.mrb[11].mxu1 }
 0x155   : > { %v2385_v43 = vrot.slane %v879_v31, %v2324_v6 }
 0x156   : > { %801 = vrot.lane.b32.xlu0 %v794_v38, %s2029_s15  ;;  %733 = vrot.lane.b32.xlu1 %v726_v39, %s2028_s17  ;;  %v2377_v38 = vrot.slane %v809_v27, %v2326_v7 }
 0x159   : > { %v864_v45 = vpop.f32.mrb[12].mxu0  ;;  %v934_v46 = vpop.f32.mrb[12].mxu1 }
 0x15a   : > { %803 = vrot.lane.b32.xlu1 %v796_v40, %s2029_s15  ;;  %871 = vrot.lane.b32.xlu0 %v864_v45, %s2030_s26  ;;  %v866_v47 = vpop.f32.mrb[13].mxu0  ;;  %v936_v48 = vpop.f32.mrb[13].mxu1 }
 0x15b   : > { %v868_v49 = vpop.f32.mrb[14].mxu0  ;;  %v938_v50 = vpop.f32.mrb[14].mxu1 }
 0x15c   : > { %v869_v51 = vpop.f32.mrb[15].mxu0  ;;  %v939_v52 = vpop.f32.mrb[15].mxu1 }
 0x15d   : > { %v2396_v51 = vrot.slane %v879_v31, %v2326_v7 }
 0x15e   : > { %941 = vrot.lane.b32.xlu0 %v934_v46, %s2031_s22  ;;  %873 = vrot.lane.b32.xlu1 %v866_v47, %s2030_s26 }
 0x161   : > { %v1004_v54 = vpop.f32.mrb[16].mxu0 }
 0x162   : > { %1038 = vperm.xlu0 %1884, %v1035_v53   ;;  %943 = vrot.lane.b32.xlu1 %v936_v48, %s2031_s22  ;;  %v1006_v55 = vpop.f32.mrb[17].mxu0  ;;  %v949_v48 = vld [vmem:[#allocation6 + $0xc] sm:$0x3] }
 0x163   : > { %v1008_v56 = vpop.f32.mrb[18].mxu0 }
 0x164   : > { %v1009_v58 = vpop.f32.mrb[19].mxu0 }
 0x165   : > { %v2409_v58 = vrot.slane %v949_v48, %v2326_v7 }
 0x166   : > { %1549 = vperm.xlu0 %1884, %v1546_v57   ;;  %1011 = vrot.lane.b32.xlu1 %v1004_v54, %s2636_s16  ;;  %v2406_v57 = vrot.slane %v949_v48, %v2324_v6  ;;  %v1049_v48 = vld [vmem:[%s2625_s5] sm:$0x3] }
 0x16a   : > { %1013 = vrot.lane.b32.xlu1 %v1006_v55, %s2636_s16 }
 0x1b4   : > { %v479_v59 = vpop.permute.xlu0 %478 }
 0x1b8   : > { %v481_v60 = vpop.permute.xlu0 %480 }
 0x1b9   : > { %v485_v15 = vsel %vm484_vm2, %v479_v59, %v481_v60  ;;  %v486_v16 = vsel %vm484_vm2, %v481_v60, %v479_v59 }
 0x1ba   : > { %v499_v28 = vmul.f32 %v2330_v11, %v486_v16  ;;  %v500_v29 = vmul.f32 %v2333_v12, %v485_v15 }
 0x1bc   : > { %v592_v61 = vpop.permute.xlu1 %591  ;;  %v662_v63 = vpop.permute.xlu0 %661  ;;  %v539_v44 = vadd.f32 %v2296_v22, %v499_v28  ;;  %v541_v45 = vadd.f32 %v2299_v24, %v500_v29 }
 0x1c0   : > { %v594_v1 = vpop.permute.xlu1 %593 }
 0x1c1   : > { %v596_v21 = vsel %vm595_vm3, %v592_v61, %v594_v1  ;;  %v597_v23 = vsel %vm595_vm3, %v594_v1, %v592_v61  ;;  %v1019_v1 = vld [vmem:[#allocation6 + $0xe] sm:$0x3] }
 0x1c2   : > { %v611_v35 = vmul.f32 %v2341_v18, %v597_v23  ;;  %v612_v36 = vmul.f32 %v2344_v19, %v596_v21  ;;  %v2424_v15 = vrot.slane %v1019_v1, %v2326_v7 }
 0x1c4   : > { %v664_v4 = vpop.permute.xlu1 %663  ;;  %v732_v5 = vpop.permute.xlu0 %731  ;;  %v613_v52 = vadd.f32 %v611_v35, %v539_v44  ;;  %v614_v22 = vadd.f32 %v612_v36, %v541_v45 }
 0x1c5   : > { %v666_v32 = vsel %vm665_vm4, %v662_v63, %v664_v4  ;;  %v667_v33 = vsel %vm665_vm4, %v664_v4, %v662_v63 }
 0x1c6   : > { %v681_v46 = vmul.f32 %v2352_v25, %v667_v33  ;;  %v682_v47 = vmul.f32 %v2355_v26, %v666_v32 }
 0x1c8   : > { %v734_v9 = vpop.permute.xlu1 %733  ;;  %v802_v14 = vpop.permute.xlu0 %801  ;;  %v683_v59 = vadd.f32 %v681_v46, %v613_v52  ;;  %v684_v60 = vadd.f32 %v682_v47, %v614_v22  ;;  %v1785_v52 = vld [vmem:[%s2625_s5 + $0x4] sm:$0x3]  ;;  %v1788_v22 = vld [vmem:[%s2625_s5 + $0x6] sm:$0x3] }
 0x1c9   : > { %v736_v41 = vsel %vm735_vm5, %v732_v5, %v734_v9  ;;  %v737_v42 = vsel %vm735_vm5, %v734_v9, %v732_v5 }
 0x1ca   : > { %v751_v24 = vmul.f32 %v2361_v30, %v737_v42  ;;  %v752_v53 = vmul.f32 %v2368_v34, %v736_v41 }
 0x1cc   : > { %v804_v20 = vpop.permute.xlu1 %803  ;;  %v872_v39 = vpop.permute.xlu0 %871  ;;  %v753_v5 = vadd.f32 %v751_v24, %v683_v59  ;;  %v754_v8 = vadd.f32 %v752_v53, %v684_v60  ;;  %v1791_v24 = vld [vmem:[%s2625_s5 + $0xa] sm:$0x3]  ;;  %v1794_v53 = vld [vmem:[%s2625_s5 + $0xc] sm:$0x3] }
 0x1cd   : > { %v806_v49 = vsel %vm805_vm6, %v802_v14, %v804_v20  ;;  %v807_v50 = vsel %vm805_vm6, %v804_v20, %v802_v14  ;;  %v2421_v14 = vrot.slane %v1019_v1, %v2324_v6 }
 0x1ce   : > { %v821_v61 = vmul.f32 %v2374_v37, %v806_v49  ;;  %v822_v62 = vmul.f32 %v2377_v38, %v807_v50  ;;  %v1777_v49 = vld [vmem:[%s2625_s5 + $0x8] sm:$0x3]  ;;  %v1782_v50 = vld [vmem:[%s2625_s5 + $0x2] sm:$0x3] }
 0x1d0   : > { %v874_v40 = vpop.permute.xlu1 %873  ;;  %v942_v63 = vpop.permute.xlu0 %941  ;;  %v823_v16 = vadd.f32 %v821_v61, %v753_v5  ;;  %v824_v17 = vadd.f32 %v822_v62, %v754_v8 }
 0x1d1   : > { %v876_v55 = vsel %vm875_vm7, %v872_v39, %v874_v40  ;;  %v877_v56 = vsel %vm875_vm7, %v874_v40, %v872_v39 }
 0x1d2   : > { %v891_v9 = vmul.f32 %v2385_v43, %v876_v55  ;;  %v892_v10 = vmul.f32 %v2396_v51, %v877_v56  ;;  %v1800_v55 = vld [vmem:[%s2625_s5 + $0x10] sm:$0x3] }
 0x1d4   : > { %v944_v54 = vpop.permute.xlu1 %943  ;;  %v893_v23 = vadd.f32 %v891_v9, %v823_v16  ;;  %v894_v27 = vadd.f32 %v892_v10, %v824_v17 }
 0x1d5   : > { %v946_v2 = vsel %vm945_vm8, %v942_v63, %v944_v54  ;;  %v947_v4 = vsel %vm945_vm8, %v944_v54, %v942_v63  ;;  %v1797_v54 = vld [vmem:[%s2625_s5 + $0xe] sm:$0x3] }
 0x1d6   : > { %v961_v20 = vmul.f32 %v2406_v57, %v946_v2  ;;  %v962_v21 = vmul.f32 %v2409_v58, %v947_v4 }
 0x1d8   : > { %v1012_v13 = vpop.permute.xlu1 %1011  ;;  %v963_v6 = vadd.f32 %v961_v20, %v893_v23  ;;  %v964_v32 = vadd.f32 %v962_v21, %v894_v27 }
 0x1dc   : > { %v1014_v28 = vpop.permute.xlu1 %1013 }
 0x1dd   : > { %v1016_v29 = vsel %vm1015_vm9, %v1012_v13, %v1014_v28  ;;  %v1017_v31 = vsel %vm1015_vm9, %v1014_v28, %v1012_v13 }
 0x1de   : > { %v1031_v7 = vmul.f32 %v2421_v14, %v1016_v29  ;;  %v1032_v33 = vmul.f32 %v2424_v15, %v1017_v31 }
 0x1e0   : > { %v1033_v35 = vadd.f32 %v1031_v7, %v963_v6  ;;  %v1034_v36 = vadd.f32 %v1032_v33, %v964_v32 }
 0x1e1   : > { %v1039_v39 = vpop.permute.xlu0 %1038 }
 0x1e2   : > { %v1041_v40 = vadd.f32 %v1039_v39, %v1033_v35  ;;  %v1042_v41 = vadd.f32 %v1039_v39, %v1034_v36 }
 0x1e4   : > { %v1043_v42 = vmax.f32 %v1041_v40, 0.0  ;;  %v1044_v44 = vmax.f32 %v1042_v41, 0.0 }
 0x1e6   : > { %v1045_v45 = vpack.c.bf16 %v1043_v42, %v1043_v42  ;;  %v1046_v46 = vpack.c.bf16 %v1044_v44, %v1044_v44 }
 0x1e8   : > { %v1056_v47 = vsel %vm1054_vm10, %v1045_v45, 0  ;;  %1778 = vmatprep.subr.msk.bf16.mxu1 %vm1054_vm10, %v1046_v46  ;;  %1780 = vmatprep.subr.msk.bf16.mxu0 %vm1054_vm10, %v1046_v46 }
 0x1e9   : > { %1062 = vmatpush1.bf16.msra.mxu1 %v1056_v47  ;;  %1114 = vmatpush1.bf16.msra.mxu0 %v1056_v47 }
 0x1ea   : > { %1783 = vmatprep.subr.msk.bf16.mxu1 %vm1054_vm10, %v1046_v46  ;;  %1786 = vmatprep.subr.msk.bf16.mxu0 %vm1054_vm10, %v1046_v46 }
 0x1ec   : > { %1779 = vmatmul.mubr.msk.bf16.vlgmr.msra.gmra.mrb[16].mxu1 %vm1050_vm11, %v1049_v48  ;;  %1781 = vmatmul.mubr.msk.bf16.vlgmr.msra.gmra.mrb[20].mxu0 %vm1050_vm11, %v1777_v49 }
 0x1ed   : > { %1160 = vmatpush1.bf16.msra.mxu1 %v1056_v47  ;;  %1216 = vmatpush1.bf16.msra.mxu0 %v1056_v47 }
 0x1ee   : > { %1789 = vmatprep.subr.msk.bf16.mxu1 %vm1054_vm10, %v1046_v46  ;;  %1792 = vmatprep.subr.msk.bf16.mxu0 %vm1054_vm10, %v1046_v46 }
 0x1ef   : > { %1191 = vmatprep.mubr.bf16.mxu1 %v2024_v0  ;;  %1247 = vmatprep.mubr.bf16.mxu0 %v2024_v0 }
 0x1f4   : > { %1784 = vmatmul.mubr.msk.bf16.vlgmr.msra.gmra.mrb[20].mxu1 %vm1050_vm11, %v1782_v50  ;;  %1787 = vmatmul.mubr.msk.bf16.vlgmr.msra.gmra.mrb[24].mxu0 %vm1050_vm11, %v1785_v52 }
 0x1f5   : > { %1272 = vmatpush1.bf16.msra.mxu1 %v1056_v47  ;;  %1328 = vmatpush1.bf16.msra.mxu0 %v1056_v47 }
 0x1f6   : > { %1795 = vmatprep.subr.msk.bf16.mxu1 %vm1054_vm10, %v1046_v46  ;;  %1798 = vmatprep.subr.msk.bf16.mxu0 %vm1054_vm10, %v1046_v46 }
 0x1f7   : > { %1303 = vmatprep.mubr.bf16.mxu1 %v2024_v0  ;;  %1359 = vmatprep.mubr.bf16.mxu0 %v2024_v0 }
 0x1fc   : > { %1790 = vmatmul.mubr.msk.bf16.vlgmr.msra.gmra.mrb[24].mxu1 %vm1050_vm11, %v1788_v22  ;;  %1793 = vmatmul.mubr.msk.bf16.vlgmr.msra.gmra.mrb[28].mxu0 %vm1050_vm11, %v1791_v24 }
 0x1fd   : > { %1384 = vmatpush1.bf16.msra.mxu1 %v1056_v47  ;;  %1440 = vmatpush1.bf16.msra.mxu0 %v1056_v47 }
 0x1fe   : > { %1801 = vmatprep.subr.msk.bf16.mxu1 %vm1054_vm10, %v1046_v46  ;;  %1415 = vmatprep.mubr.bf16.mxu1 %v2024_v0  ;;  %v1559_v46 = vld [vmem:[%s2628_s8] sm:$0x3] }
 0x1ff   : > { %1471 = vmatprep.mubr.bf16.mxu0 %v2024_v0 }
 0x204   : > { %1796 = vmatmul.mubr.msk.bf16.vlgmr.msra.gmra.mrb[28].mxu1 %vm1050_vm11, %v1794_v53  ;;  %1799 = vmatmul.mubr.msk.bf16.vlgmr.msra.gmra.mrb[32].mxu0 %vm1050_vm11, %v1797_v54 }
 0x205   : > { %1496 = vmatpush1.bf16.msra.mxu1 %v1056_v47  ;;  %1527 = vmatprep.mubr.bf16.mxu1 %v2024_v0  ;;  %v2511_v47 = vpop.permute.xlu0 %1549 }
 0x206   : > { %1606 = vmatprep.mubr.bf16.mxu0 %v2024_v0 }
 0x20c   : > { %1802 = vmatmul.mubr.msk.bf16.vlgmr.msra.gmra.mrb[32].mxu1 %vm1050_vm11, %v1800_v55 }
 0x2bf   : > { %v1095_v56 = vpop.f32.mrb[16].mxu1  ;;  %v2488_v59 = vpop.f32.mrb[20].mxu0 }
 0x2c0   : > { %1102 = vrot.lane.b32.xlu0 %v1095_v56, %s2025_s27  ;;  %v1097_v60 = vpop.f32.mrb[17].mxu1  ;;  %v2491_v61 = vpop.f32.mrb[21].mxu0 }
 0x2c1   : > { %1104 = vrot.lane.b32.xlu1 %v1097_v60, %s2025_s27  ;;  %v1099_v62 = vpop.f32.mrb[18].mxu1  ;;  %v1151_v63 = vpop.f32.mrb[22].mxu0  ;;  %s2651_s27 = smov 111  }
 0x2c2   : > { %v1100_v1 = vpop.f32.mrb[19].mxu1  ;;  %v1152_v0 = vpop.f32.mrb[23].mxu0 }
 0x2c7   : > { %v1193_v2 = vpop.f32.mrb[20].mxu1  ;;  %v1249_v4 = vpop.f32.mrb[24].mxu0 }
 0x2c8   : > { %1200 = vrot.lane.b32.xlu0 %v1193_v2, %s2026_s18  ;;  %v1195_v5 = vpop.f32.mrb[21].mxu1  ;;  %v1251_v8 = vpop.f32.mrb[25].mxu0 }
 0x2c9   : > { %1202 = vrot.lane.b32.xlu1 %v1195_v5, %s2026_s18  ;;  %v1197_v9 = vpop.f32.mrb[22].mxu1  ;;  %v1253_v10 = vpop.f32.mrb[26].mxu0 }
 0x2ca   : > { %v1198_v13 = vpop.f32.mrb[23].mxu1  ;;  %v1254_v16 = vpop.f32.mrb[27].mxu0 }
 0x2cc   : > { %1256 = vrot.lane.b32.xlu0 %v1249_v4, %s2027_s20 }
 0x2cd   : > { %1258 = vrot.lane.b32.xlu1 %v1251_v8, %s2027_s20 }
 0x2cf   : > { %v1305_v17 = vpop.f32.mrb[24].mxu1  ;;  %v1361_v20 = vpop.f32.mrb[28].mxu0 }
 0x2d0   : > { %v1307_v21 = vpop.f32.mrb[25].mxu1  ;;  %1312 = vrot.lane.b32.xlu0 %v1305_v17, %s2028_s17  ;;  %v1363_v23 = vpop.f32.mrb[29].mxu0 }
 0x2d1   : > { %v1309_v27 = vpop.f32.mrb[26].mxu1  ;;  %1314 = vrot.lane.b32.xlu1 %v1307_v21, %s2028_s17  ;;  %v1365_v28 = vpop.f32.mrb[30].mxu0 }
 0x2d2   : > { %v1310_v29 = vpop.f32.mrb[27].mxu1  ;;  %v1366_v31 = vpop.f32.mrb[31].mxu0 }
 0x2d4   : > { %1368 = vrot.lane.b32.xlu0 %v1361_v20, %s2029_s15 }
 0x2d5   : > { %1370 = vrot.lane.b32.xlu1 %v1363_v23, %s2029_s15 }
 0x2d7   : > { %v1417_v6 = vpop.f32.mrb[28].mxu1  ;;  %v1473_v32 = vpop.f32.mrb[32].mxu0 }
 0x2d8   : > { %v1419_v7 = vpop.f32.mrb[29].mxu1  ;;  %1424 = vrot.lane.b32.xlu0 %v1417_v6, %s2030_s26  ;;  %v1475_v33 = vpop.f32.mrb[33].mxu0 }
 0x2d9   : > { %v1421_v35 = vpop.f32.mrb[30].mxu1  ;;  %1426 = vrot.lane.b32.xlu1 %v1419_v7, %s2030_s26  ;;  %v1477_v36 = vpop.f32.mrb[34].mxu0  ;;  %s1744_s26 = sshll.u32 %s2220_s25, 2 }
 0x2da   : > { %v1422_v39 = vpop.f32.mrb[31].mxu1  ;;  %v1478_v40 = vpop.f32.mrb[35].mxu0  ;;  %s378_s16 = scalar_lea.vmem [#allocation8], %s1744_s26 }
 0x2db   : > { %s1642_s24 = sshll.u32 %s378_s16, 4  ;;  %s2578_s24 = int_to_ptr.vmem [resolvable:$true] %s1642_s24 }
 0x2dc   : > { %1480 = vrot.lane.b32.xlu0 %v1473_v32, %s2031_s22 }
 0x2dd   : > { %1482 = vrot.lane.b32.xlu1 %v1475_v33, %s2031_s22  ;;  %s1815_s22 = sshll.u32 %s2105_s13, 6  ;;  %s2033_s13 = smov [#allocation8]  }
 0x2de   : > { %s2576_s21 = scalar_lea.hbm %s2629_s9, %s1815_s22  ;;  %s1952_s18 = sshll.u32 %s2033_s13, 4  ;;  %s1953_s18 = int_to_ptr.vmem [resolvable:$false] %s1952_s18 }
 0x2df   : > { %v1529_v41 = vpop.f32.mrb[32].mxu1  ;;  %s1954_s20 = scalar_lea.vmem %s1953_s18, 128  ;;  %p1955_p13 = scmp.lt.s32.totalorder %s2578_s24, %s1953_s18 }
 0x2e0   : > { %v1531_v42 = vpop.f32.mrb[33].mxu1 }
 0x2e1   : > { %v1533_v44 = vpop.f32.mrb[34].mxu1  ;;  %1538 = vrot.lane.b32.xlu0 %v1531_v42, %s2651_s27  ;;  %1536 = vrot.lane.b32.xlu1 %v1529_v41, %s2651_s27  ;;  %s1948_s27 = scalar_lea.vmem %s2578_s24, 64 }
 0x2e2   : > { %v1534_v45 = vpop.f32.mrb[35].mxu1  ;;  %p1949_p6 = scmp.ne.s32.totalorder %s2578_s24, %s1948_s27  ;;  %p1956_p3 = scmp.lt.s32.totalorder %s1954_s20, %s1948_s27 }
 0x2e4   : > { %p1950_p8 = pnand %p1949_p6, %p2175_p12  ;;  %p1957_p7 = por %p1956_p3, %p1955_p13 }
 0x2e5   : > { %1562 = vperm.xlu1 %1885, %v1559_v46  }
 0x2e6   : > { %p1951_p10 = pneg %p1950_p8 }
 0x2e8   : > { %p1958_p9 = pnand %p1957_p7, %p1951_p10 }
 0x332   : > { %v1103_v48 = vpop.permute.xlu0 %1102 }
 0x333   : > { %v1105_v49 = vpop.permute.xlu1 %1104 }
 0x334   : > { %v1106_v53 = vsel %vm484_vm2, %v1103_v48, %v1105_v49  ;;  %v1107_v54 = vsel %vm484_vm2, %v1105_v49, %v1103_v48 }
 0x335   : > { %v1108_v63 = vmul.f32 %v1107_v54, %v2330_v11  ;;  %v1109_v1 = vmul.f32 %v1106_v53, %v2333_v12 }
 0x337   : > { %v1148_v12 = vadd.f32 %v2488_v59, %v1108_v63  ;;  %v1150_v13 = vadd.f32 %v2491_v61, %v1109_v1 }
 0x33a   : > { %v1201_v50 = vpop.permute.xlu0 %1200 }
 0x33b   : > { %v1203_v52 = vpop.permute.xlu1 %1202 }
 0x33c   : > { %v1204_v60 = vsel %vm595_vm3, %v1201_v50, %v1203_v52  ;;  %v1205_v62 = vsel %vm595_vm3, %v1203_v52, %v1201_v50 }
 0x33d   : > { %v1206_v5 = vmul.f32 %v1205_v62, %v2341_v18  ;;  %v1207_v8 = vmul.f32 %v1204_v60, %v2344_v19 }
 0x33e   : > { %v1257_v22 = vpop.permute.xlu0 %1256 }
 0x33f   : > { %v1259_v24 = vpop.permute.xlu1 %1258  ;;  %v1208_v21 = vadd.f32 %v1206_v5, %v1148_v12  ;;  %v1209_v23 = vadd.f32 %v1207_v8, %v1150_v13 }
 0x340   : > { %v1260_v0 = vsel %vm665_vm4, %v1257_v22, %v1259_v24  ;;  %v1261_v2 = vsel %vm665_vm4, %v1259_v24, %v1257_v22 }
 0x341   : > { %v1262_v16 = vmul.f32 %v1261_v2, %v2352_v25  ;;  %v1263_v17 = vmul.f32 %v1260_v0, %v2355_v26 }
 0x342   : > { %v1313_v55 = vpop.permute.xlu0 %1312 }
 0x343   : > { %v1315_v56 = vpop.permute.xlu1 %1314  ;;  %v1264_v26 = vadd.f32 %v1262_v16, %v1208_v21  ;;  %v1265_v29 = vadd.f32 %v1263_v17, %v1209_v23 }
 0x344   : > { %v1316_v10 = vsel %vm735_vm5, %v1313_v55, %v1315_v56  ;;  %v1317_v11 = vsel %vm735_vm5, %v1315_v56, %v1313_v55 }
 0x345   : > { %v1318_v27 = vmul.f32 %v1317_v11, %v2361_v30  ;;  %v1319_v28 = vmul.f32 %v1316_v10, %v2368_v34 }
 0x346   : > { %v1369_v4 = vpop.permute.xlu0 %1368 }
 0x347   : > { %v1371_v9 = vpop.permute.xlu1 %1370  ;;  %v1320_v7 = vadd.f32 %v1318_v27, %v1264_v26  ;;  %v1321_v33 = vadd.f32 %v1319_v28, %v1265_v29 }
 0x348   : > { %v1372_v18 = vsel %vm805_vm6, %v1369_v4, %v1371_v9  ;;  %v1373_v19 = vsel %vm805_vm6, %v1371_v9, %v1369_v4 }
 0x349   : > { %v1374_v31 = vmul.f32 %v1372_v18, %v2374_v37  ;;  %v1375_v6 = vmul.f32 %v1373_v19, %v2377_v38 }
 0x34a   : > { %v1425_v20 = vpop.permute.xlu0 %1424 }
 0x34b   : > { %v1427_v59 = vpop.permute.xlu1 %1426  ;;  %v1376_v40 = vadd.f32 %v1374_v31, %v1320_v7  ;;  %v1377_v41 = vadd.f32 %v1375_v6, %v1321_v33 }
 0x34c   : > { %v1428_v61 = vsel %vm875_vm7, %v1425_v20, %v1427_v59  ;;  %v1429_v25 = vsel %vm875_vm7, %v1427_v59, %v1425_v20 }
 0x34d   : > { %v1430_v30 = vmul.f32 %v1428_v61, %v2385_v43  ;;  %v1431_v34 = vmul.f32 %v1429_v25, %v2396_v51 }
 0x34e   : > { %v1481_v32 = vpop.permute.xlu0 %1480 }
 0x34f   : > { %v1483_v35 = vpop.permute.xlu1 %1482  ;;  %v1432_v42 = vadd.f32 %v1430_v30, %v1376_v40  ;;  %v1433_v44 = vadd.f32 %v1431_v34, %v1377_v41 }
 0x350   : > { %v1484_v36 = vsel %vm945_vm8, %v1481_v32, %v1483_v35  ;;  %v1485_v39 = vsel %vm945_vm8, %v1483_v35, %v1481_v32 }
 0x351   : > { %v1486_v37 = vmul.f32 %v1484_v36, %v2406_v57  ;;  %v1487_v38 = vmul.f32 %v1485_v39, %v2409_v58 }
 0x353   : > { %v1539_v45 = vpop.permute.xlu0 %1538  ;;  %v1537_v46 = vpop.permute.xlu1 %1536  ;;  %v1488_v48 = vadd.f32 %v1486_v37, %v1432_v42  ;;  %v1489_v49 = vadd.f32 %v1487_v38, %v1433_v44 }
 0x354   : > { %v1540_v43 = vsel %vm1015_vm9, %v1537_v46, %v1539_v45  ;;  %v1541_v51 = vsel %vm1015_vm9, %v1539_v45, %v1537_v46 }
 0x355   : > { %v1542_v50 = vmul.f32 %v1540_v43, %v2421_v14  ;;  %v1543_v52 = vmul.f32 %v1541_v51, %v2424_v15  ;;  %v1556_v14 = vld [vmem:[%s2627_s7] sm:$0x1] }
 0x357   : > { %v1544_v57 = vadd.f32 %v1542_v50, %v1488_v48  ;;  %v1545_v22 = vadd.f32 %v1543_v52, %v1489_v49 }
 0x359   : > { %v1553_v58 = vadd.f32 %v2511_v47, %v1545_v22  ;;  %v1552_v24 = vadd.f32 %v2511_v47, %v1544_v57 }
 0x35b   : > { %v1555_v53 = vmax.f32 %v1553_v58, 0.0  ;;  %v1554_v54 = vmax.f32 %v1552_v24, 0.0 }
 0x35d   : > { %v1558_v55 = vpack.c.bf16 %v1555_v53, %v1555_v53  ;;  %v1557_v56 = vpack.c.bf16 %v1554_v54, %v1554_v54 }
 0x35f   : > { %1803 = vmatprep.subr.msk.bf16.mxu0 %vm1054_vm10, %v1558_v55  ;;  %v1569_v3 = vsel %vm1054_vm10, %v1557_v56, 0 }
 0x360   : > { %1575 = vmatpush1.bf16.msra.mxu0 %v1569_v3 }
 0x363   : > { %1804 = vmatmul.mubr.msk.bf16.vlgmr.msra.gmra.mrb[36].mxu0 %vm1050_vm11, %v1556_v14 }
 0x364   : > { %v1563_v15 = vpop.permute.xlu1 %1562 }
 0x436   : > { %v1608_v60 = vpop.f32.mrb[36].mxu0 }
 0x437   : > { %v1610_v47 = vpop.f32.mrb[37].mxu0  ;;  %v1609_v62 = vadd.f32 %v1608_v60, %v1563_v15 }
 0x438   : > { %v1612_v63 = vpop.f32.mrb[38].mxu0  ;;  %v1611_v1 = vadd.f32 %v1610_v47, %v1563_v15 }
 0x439   : > { %v1613_v0 = vpop.f32.mrb[39].mxu0 }
 0x43a   : > { %v1617_v2 = vcombine.low %v1609_v62, %v1611_v1 }
 0x43c   : > { %1805 = vst.sshfl [vmem:[%s378_s16] sm:$0x33 pattern:$0x76325410] %v1617_v2 }
 0x43d   : > { %1961 = shalt.err (!%p1958_p9)
}
 0x43e   : > { %s1962_s25 = scalar_lea.hbm %s2576_s21, 64  ;;  %s1966_s26 = scalar_lea.hbm %s2629_s9, 128 }
 0x43f   : > { %p1963_p2 = scmp.ne.s32.totalorder %s2576_s21, %s1962_s25  ;;  %p1967_p1 = scmp.lt.u32.totalorder %s2576_s21, %s2629_s9 }
 0x440   : > { %p1968_p11 = scmp.lt.u32.totalorder %s1966_s26, %s1962_s25  ;;  %p1970_p6 = scmp.lt.u32.totalorder %s1962_s25, %s2576_s21 }
 0x441   : > { %p1964_p5 = pnand %p1963_p2, %p2175_p12 }
 0x442   : > { %p1969_p4 = por %p1968_p11, %p1967_p1 }
 0x443   : > { %p1965_p0 = pneg %p1964_p5 }
 0x444   : > { %p1971_p8 = por %p1970_p6, %p1969_p4 }
 0x446   : > { %p1972_p10 = pnand %p1971_p8, %p1965_p0 }
 0x448   : > { %1975 = shalt.err (!%p1972_p10)
}
 0x449   : > { %1822 = dma.vmem_to_hbm [thread:$0]  (%p2175_p12), %s2578_s24, 64, %s2576_s21, %s1628_s23  }
 0x44a PF: > { %s2652_s14 = sld [smem:[#allocation12_spill]]  ;;  %s1654_s19 = sand.u32 1, %s2006_s30  }
 0x44b   : > { %p2654_p3 = scmp.ge.s32.totalorder %s2018_s12, 2  ;;  %s1655_s27 = scalar_lea.sflag [#allocation5], %s1654_s19 }
 0x450   : > { %p2653_p13 = scmp.ne.s32.totalorder %s2652_s14, 0 }
 0x452   : > { %p1833_p7 = pnand %p2654_p3, %p2653_p13 }
 0x454   : > { %2001 = dma.done.wait (!%p1833_p7), %s1655_s27, 64  }
 0x455   : > { %2003 = vsyncadd (!%p1833_p7), %s1655_s27, 4294967232  ;;  %s2655_s12 = sld [smem:[#allocation13_spill]]  ;;  %s2656_s30 = smov %s2010_s10 }
 0x456   : > { %s2657_s10 = smov %s2014_s11  ;;  %s2658_s11 = smov %s2171_s28 }
 0x45b   : > { %p23_p9 = scmp.ge.s32.totalorder %s2655_s12, 4  }
 0x45d   :  { %25 = sbr.rel (!%p23_p9) target bundleno = 6 (0x6), region = 131 }
 0x464   :  { %1660 = vsyncpa [#allocation4], 1 }
 0x465   :  { %1662 = vsyncpa [#allocation4 + $0x1], 1 }
 0x466   :  { %1663 = vsyncpa [#allocation7], 1 }
 0x467   :  { %1664 = vsyncpa [#allocation5], 1 }
 0x468   :  { %1666 = vsyncpa [#allocation5 + $0x1], 1 }

</bundles_post_ra>
